<compile_context>
chip_gen: v6e
topology: v6e:2x2x1
jax: 0.10.0
libtpu: 0.0.40
codegen_flags: <defaults>
</compile_context>

<pallas_src>
import functools
import numpy as np
import jax
import jax.numpy as jnp
from jax.experimental import pallas as pl
from jax.experimental.pallas import tpu as pltpu

_VMEM_FULL = pl.BlockSpec(memory_space=pltpu.MemorySpace.VMEM)
HIGH = jax.lax.Precision.HIGHEST  # reference only


# ----------------------------- Pallas kernels -----------------------------
def _down_conv_stats_kernel(s_ref, w_ref, b_ref, y_ref, st_ref, *, t_oh, ow, inv_count):
    # s_ref : (OH+1, OW+1, 4*Cin) bf16 -- whole padded+space-to-depth image (batch dim squeezed)
    # w_ref : (2, 2, 4*Cin, Cout) bf16 -- conv taps, grid-constant (resident in VMEM)
    # b_ref : (1, Cout)           f32
    # y_ref : (t_oh*OW, Cout)     bf16 -- raw conv+bias rows of this OH tile
    # st_ref: (2, Cout)           f32  -- per-tile [sum, centered sum-of-squares] (BN partials)
    row0 = pl.multiple_of(pl.program_id(1) * t_oh, t_oh)
    acc = None
    # 4x4 stride-2 conv == 2x2 stride-1 conv on the space-to-depth input: 4 taps, MXU matmuls
    for ta in range(2):
        for tb in range(2):
            xt = s_ref[pl.ds(row0 + ta, t_oh), pl.ds(tb, ow), :]       # (t_oh, OW, 4*Cin)
            xt = xt.reshape(t_oh * ow, xt.shape[-1])                    # merge leading dims only
            part = jnp.dot(xt, w_ref[ta, tb], preferred_element_type=jnp.float32)
            acc = part if acc is None else acc + part
    y = acc + b_ref[...]                                                # (rows, Cout) f32
    y_ref[...] = y.astype(y_ref.dtype)
    # per-tile centered stats (exactly mergeable across tiles; avoids E[y^2]-E[y]^2 cancellation)
    s1 = jnp.sum(y, axis=0, keepdims=True)                              # (1, Cout)
    mu = s1 * inv_count
    d = y - mu
    st_ref[0:1, :] = s1
    st_ref[1:2, :] = jnp.sum(d * d, axis=0, keepdims=True)


def _cls_cond_kernel(y_ref, sc_ref, sh_ref, v_ref, o_ref, *, ksz, oh2, ow2):
    # y_ref : (N, OH, OW, C)     bf16 -- raw conv output of the final DownBlock
    # sc/sh : (1, 1, 1, C)       f32  -- fused BatchNorm scale / shift of that block
    # v_ref : (N, ksz, ksz, C)   f32  -- cls conv weights folded with cmap and 1/sqrt(cmap_dim)
    # o_ref : (N, OH2, OW2)      f32
    x = y_ref[...].astype(jnp.float32) * sc_ref[...] + sh_ref[...]      # BatchNorm (batch stats)
    x = jnp.where(x >= 0.0, x, 0.2 * x)                                 # LeakyReLU(0.2)
    vv = v_ref[...]
    acc = jnp.zeros(o_ref.shape, jnp.float32)
    # cls conv + conditional channel reduction, folded:  sum_c x[..,c] * (W2 @ cmap)[..,c]
    for kh in range(ksz):
        for kw in range(ksz):
            vt = vv[:, kh:kh + 1, kw:kw + 1, :]                         # (N, 1, 1, C)
            acc = acc + jnp.sum(x[:, kh:kh + oh2, kw:kw + ow2, :] * vt, axis=-1)
    o_ref[...] = acc


# ----------------------------- wrapper glue (layout only, 1x data) -----------------------------
def _space_to_depth_pad1(x):
    # x: (N, H, W, C) -> pad 1, group 2x2 pixels into channels -> (N, H/2+1, W/2+1, 4C)
    n, hh, ww, c = x.shape
    xp = jnp.pad(x, ((0, 0), (1, 1), (1, 1), (0, 0)))
    s = xp.reshape(n, (hh + 2) // 2, 2, (ww + 2) // 2, 2, c)
    s = s.transpose(0, 1, 3, 2, 4, 5)
    return s.reshape(n, (hh + 2) // 2, (ww + 2) // 2, 4 * c)


def _conv_w_to_s2d_taps(w):
    # (Cout, Cin, 4, 4) -> (2, 2, 4*Cin, Cout); tap (a,b), flat index = (r*2+s)*Cin + ci
    cout, cin = w.shape[0], w.shape[1]
    wt = w.reshape(cout, cin, 2, 2, 2, 2)         # (co, ci, a, r, b, s)
    wt = wt.transpose(2, 4, 3, 5, 1, 0)           # (a, b, r, s, ci, co)
    return wt.reshape(2, 2, 4 * cin, cout)


def _pick_t_oh(oh, ow, target_rows=512):
    # at least two row-tiles (exercise the grid) and cap rows/tile for VMEM
    t = oh
    if t % 2 == 0:
        t //= 2
    while t % 2 == 0 and t * ow > target_rows:
        t //= 2
    return max(t, 1)


def single_disc_cond_forward(x, c, params, cmap_dim):
    f32, bf16 = jnp.float32, jnp.bfloat16
    n = x.shape[0]
    # NCHW -> NHWC once; cast to bf16 BEFORE any layout work.
    h = x.astype(bf16).transpose(0, 2, 3, 1)

    nblk = len(params["blocks"])
    y = scale = shift = None
    oh = ow_ = cout = None

    for bi, blk in enumerate(params["blocks"]):
        cout, cin = blk["w"].shape[0], blk["w"].shape[1]
        oh, ow_ = h.shape[1] // 2, h.shape[2] // 2
        s = _space_to_depth_pad1(h)                                   # (N, OH+1, OW+1, 4Cin) bf16
        wt = _conv_w_to_s2d_taps(blk["w"]).astype(bf16)               # (2, 2, 4Cin, Cout)
        bias = blk["b"].reshape(1, cout).astype(f32)

        t_oh = _pick_t_oh(oh, ow_)
        n_t = oh // t_oh
        count = t_oh * ow_
        rows = n * oh * ow_

        y, stats = pl.pallas_call(
            functools.partial(_down_conv_stats_kernel, t_oh=t_oh, ow=ow_,
                              inv_count=1.0 / count),
            grid=(n, n_t),
            in_specs=[
                pl.BlockSpec((None, oh + 1, ow_ + 1, 4 * cin), lambda ni, ti: (ni, 0, 0, 0)),
                pl.BlockSpec((2, 2, 4 * cin, cout), lambda ni, ti: (0, 0, 0, 0)),
                pl.BlockSpec((1, cout), lambda ni, ti: (0, 0)),
            ],
            out_specs=[
                pl.BlockSpec((None, count, cout), lambda ni, ti: (ni, ti, 0)),
                pl.BlockSpec((None, None, 2, cout), lambda ni, ti: (ni, ti, 0, 0)),
            ],
            out_shape=(
                jax.ShapeDtypeStruct((n, oh * ow_, cout), bf16),
                jax.ShapeDtypeStruct((n, n_t, 2, cout), f32),
            ),
            compiler_params=pltpu.CompilerParams(
                dimension_semantics=("parallel", "parallel"),
                vmem_limit_bytes=32 * 1024 * 1024),
        )(s, wt, bias)

        # exact cross-tile BatchNorm stat merge (all tiles have equal count), biased var, eps=1e-5
        s1, ssq = stats[:, :, 0, :], stats[:, :, 1, :]
        mean = jnp.sum(s1, axis=(0, 1)) / rows
        tmean = s1 / count
        var = (jnp.sum(ssq, axis=(0, 1))
               + count * jnp.sum((tmean - mean) ** 2, axis=(0, 1))) / rows
        scale = blk["gamma"] * jax.lax.rsqrt(var + 1e-5)
        shift = blk["beta"] - mean * scale

        if bi < nblk - 1:
            # Intermediate blocks: normalize+LeakyReLU in plain XLA, because the next conv's
            # ZERO padding must be applied AFTER the activation (fusing into the next kernel
            # would activate the pad ring); XLA fuses this with the space-to-depth transform.
            hf = y.astype(f32) * scale + shift
            hf = jnp.where(hf >= 0.0, hf, 0.2 * hf)
            h = hf.astype(bf16).reshape(n, oh, ow_, cout)

    # ---- cls conv + conditional reduction (final block's BN+LeakyReLU fused in) ----
    y_nhwc = y.reshape(n, oh, ow_, cout)

    # class conditioning (tiny) in plain XLA, then fold cmap into the cls conv weights
    idx = jnp.argmax(c, axis=1)
    e = jnp.take(params["embed"], idx, axis=0)                          # (N, embedding_dim)
    cm = e @ params["proj_w"].T + params["proj_b"]
    cm = jnp.where(cm >= 0.0, cm, 0.2 * cm)                             # (N, cmap_dim)
    w2t = params["cls_w"].transpose(2, 3, 1, 0)                         # (4, 4, C, cmap_dim)
    v = jnp.einsum("hwcd,nd->nhwc", w2t, cm) * (1.0 / np.sqrt(cmap_dim))  # (N, 4, 4, C)

    ksz = params["cls_w"].shape[-1]
    oh2, ow2 = oh - ksz + 1, ow_ - ksz + 1
    out = pl.pallas_call(
        functools.partial(_cls_cond_kernel, ksz=ksz, oh2=oh2, ow2=ow2),
        out_shape=jax.ShapeDtypeStruct((n, oh2, ow2), jnp.float32),
        in_specs=[_VMEM_FULL] * 4,
        out_specs=_VMEM_FULL,
    )(y_nhwc,
      scale.reshape(1, 1, 1, cout).astype(f32),
      shift.reshape(1, 1, 1, cout).astype(f32),
      v.astype(f32))

    return out[:, None, :, :]                                           # (N, 1, OH2, OW2)


# ----------------------------- pure-JAX reference -----------------------------
def _leaky(y):
    return jnp.where(y >= 0.0, y, 0.2 * y)


def _conv_ref(x, w, b, stride, pad):
    y = jax.lax.conv_general_dilated(x, w, (stride, stride), [(pad, pad), (pad, pad)],
                                     dimension_numbers=("NCHW", "OIHW", "NCHW"),
                                     precision=HIGH)
    if b is not None:
        y = y + b[None, :, None, None]
    return y


def forward_ref(x, c, params, cmap_dim):
    h = x
    for blk in params["blocks"]:
        y = _conv_ref(h, blk["w"], blk["b"], 2, 1)
        mean = jnp.mean(y, axis=(0, 2, 3), keepdims=True)
        var = jnp.mean((y - mean) ** 2, axis=(0, 2, 3), keepdims=True)
        y = (y - mean) * jax.lax.rsqrt(var + 1e-5) * blk["gamma"][None, :, None, None] \
            + blk["beta"][None, :, None, None]
        h = _leaky(y)
    out = _conv_ref(h, params["cls_w"], None, 1, 0)
    idx = jnp.argmax(c, axis=1)
    e = params["embed"][idx]
    cmap = _leaky(e @ params["proj_w"].T + params["proj_b"])
    return jnp.sum(out * cmap[:, :, None, None], axis=1, keepdims=True) / np.sqrt(cmap_dim)


# ----------------------------- parameters -----------------------------
def build_params(key, nc, ndf, start_sz, end_sz, c_dim, cmap_dim, embedding_dim):
    channel_dict = {4: 512, 8: 512, 16: 256, 32: 128, 64: 64, 128: 64,
                    256: 32, 512: 16, 1024: 8}
    nfc = dict(channel_dict) if ndf is None else {k: ndf for k in channel_dict}
    if nc is not None:
        nfc[start_sz] = nc

    keys = iter(jax.random.split(key, 64))
    blocks = []
    sz = start_sz
    while sz > end_sz:
        cin, cout = nfc[sz], nfc[sz // 2]
        blocks.append(dict(
            w=0.1 * jax.random.normal(next(keys), (cout, cin, 4, 4), jnp.float32),
            b=0.1 * jax.random.normal(next(keys), (cout,), jnp.float32),
            gamma=1.0 + 0.1 * jax.random.normal(next(keys), (cout,), jnp.float32),
            beta=0.1 * jax.random.normal(next(keys), (cout,), jnp.float32),
        ))
        sz //= 2

    return dict(
        blocks=blocks,
        cls_w=0.1 * jax.random.normal(next(keys), (cmap_dim, nfc[end_sz], 4, 4), jnp.float32),
        embed=0.1 * jax.random.normal(next(keys), (c_dim, embedding_dim), jnp.float32),
        proj_w=0.1 * jax.random.normal(next(keys), (cmap_dim, embedding_dim), jnp.float32),
        proj_b=0.1 * jax.random.normal(next(keys), (cmap_dim,), jnp.float32),
    )


# ----------------------------- main -----------------------------
if __name__ == "__main__":
    nc, ndf = 4, 32
    start_sz, end_sz = 16, 8
    c_dim, cmap_dim, embedding_dim = 10, 64, 32

    key = jax.random.PRNGKey(0)
    kx, kc, kp = jax.random.split(key, 3)
    x = jax.random.normal(kx, (2, nc, start_sz, start_sz), jnp.float32)   # NCHW
    c = jax.nn.one_hot(jax.random.randint(kc, (2,), 0, c_dim), c_dim, dtype=jnp.float32)
    params = build_params(kp, nc, ndf, start_sz, end_sz, c_dim, cmap_dim, embedding_dim)

    fwd = jax.jit(single_disc_cond_forward, static_argnums=3)
    out = jax.block_until_ready(fwd(x, c, params, cmap_dim))

    assert out.shape == (2, 1, 5, 5), out.shape
    ref = forward_ref(x, c, params, cmap_dim)
    # bf16 MXU inputs (f32 accumulation) -> compare against the f32-HIGHEST reference
    np.testing.assert_allclose(np.asarray(out), np.asarray(ref), rtol=2e-2, atol=2e-2)

    print("KERNEL_OK")
</pallas_src>

<mosaic_0001>
module attributes {stable_mosaic.version = 11 : i64} {
  func.func @_down_conv_stats_kernel(%arg0: i32, %arg1: i32, %arg2: memref<1x9x9x16xbf16, #tpu.memory_space<vmem>>, %arg3: memref<2x2x16x32xbf16, #tpu.memory_space<vmem>>, %arg4: memref<1x32xf32, #tpu.memory_space<vmem>>, %arg5: memref<1x32x32xbf16, #tpu.memory_space<vmem>>, %arg6: memref<1x1x2x32xf32, #tpu.memory_space<vmem>>) attributes {dimension_semantics = [#tpu.dimension_semantics<parallel>, #tpu.dimension_semantics<parallel>], iteration_bounds = array<i64: 2, 2>, scalar_prefetch = 0 : i64, scratch_operands = 0 : i64, tpu.core_type = #tpu.core_type<tc>, window_params = [{transform_indices = @transform_0, window_bounds = array<i64: 1, 9, 9, 16>}, {pipeline_mode = #tpu.pipeline_mode<synchronous>, transform_indices = @transform_1, window_bounds = array<i64: 2, 2, 16, 32>}, {pipeline_mode = #tpu.pipeline_mode<synchronous>, transform_indices = @transform_2, window_bounds = array<i64: 1, 32>}, {transform_indices = @transform_3, window_bounds = array<i64: 1, 32, 32>}, {transform_indices = @transform_4, window_bounds = array<i64: 1, 1, 2, 32>}]} {
    %c4_i32 = arith.constant 4 : i32
    %0 = arith.muli %arg1, %c4_i32 : i32
    %1 = tpu.assume_multiple %0, 4 : i32
    %c0_i32 = arith.constant 0 : i32
    %2 = arith.addi %1, %c0_i32 : i32
    %c0 = arith.constant 0 : index
    %3 = arith.index_cast %2 : i32 to index
    %c0_0 = arith.constant 0 : index
    %c0_1 = arith.constant 0 : index
    %4 = vector.load %arg2[%c0, %3, %c0_0, %c0_1] : memref<1x9x9x16xbf16, #tpu.memory_space<vmem>>, vector<1x4x8x16xbf16>
    %5 = vector.shape_cast %4 : vector<1x4x8x16xbf16> to vector<4x8x16xbf16>
    %6 = vector.shape_cast %5 : vector<4x8x16xbf16> to vector<32x16xbf16>
    %c0_2 = arith.constant 0 : index
    %c0_3 = arith.constant 0 : index
    %c0_4 = arith.constant 0 : index
    %c0_5 = arith.constant 0 : index
    %7 = vector.load %arg3[%c0_2, %c0_3, %c0_4, %c0_5] : memref<2x2x16x32xbf16, #tpu.memory_space<vmem>>, vector<1x1x16x32xbf16>
    %8 = vector.shape_cast %7 : vector<1x1x16x32xbf16> to vector<16x32xbf16>
    %cst = arith.constant dense<0.000000e+00> : vector<32x32xf32>
    %9 = tpu.matmul %6, %8, %cst {dimension_numbers = #tpu.dot_dimension_numbers<[1], [0], [0], [1], [0, 0, 1, 1], [], []>} : vector<32x16xbf16>, vector<16x32xbf16>, vector<32x32xf32> -> vector<32x32xf32>
    %c0_i32_6 = arith.constant 0 : i32
    %10 = arith.addi %1, %c0_i32_6 : i32
    %c0_7 = arith.constant 0 : index
    %11 = arith.index_cast %10 : i32 to index
    %c1 = arith.constant 1 : index
    %c0_8 = arith.constant 0 : index
    %12 = vector.load %arg2[%c0_7, %11, %c1, %c0_8] : memref<1x9x9x16xbf16, #tpu.memory_space<vmem>>, vector<1x4x8x16xbf16>
    %13 = vector.shape_cast %12 : vector<1x4x8x16xbf16> to vector<4x8x16xbf16>
    %14 = vector.shape_cast %13 : vector<4x8x16xbf16> to vector<32x16xbf16>
    %c0_9 = arith.constant 0 : index
    %c1_10 = arith.constant 1 : index
    %c0_11 = arith.constant 0 : index
    %c0_12 = arith.constant 0 : index
    %15 = vector.load %arg3[%c0_9, %c1_10, %c0_11, %c0_12] : memref<2x2x16x32xbf16, #tpu.memory_space<vmem>>, vector<1x1x16x32xbf16>
    %16 = vector.shape_cast %15 : vector<1x1x16x32xbf16> to vector<16x32xbf16>
    %cst_13 = arith.constant dense<0.000000e+00> : vector<32x32xf32>
    %17 = tpu.matmul %14, %16, %cst_13 {dimension_numbers = #tpu.dot_dimension_numbers<[1], [0], [0], [1], [0, 0, 1, 1], [], []>} : vector<32x16xbf16>, vector<16x32xbf16>, vector<32x32xf32> -> vector<32x32xf32>
    %18 = arith.addf %9, %17 : vector<32x32xf32>
    %c1_i32 = arith.constant 1 : i32
    %19 = arith.addi %1, %c1_i32 : i32
    %c0_14 = arith.constant 0 : index
    %20 = arith.index_cast %19 : i32 to index
    %c0_15 = arith.constant 0 : index
    %c0_16 = arith.constant 0 : index
    %21 = vector.load %arg2[%c0_14, %20, %c0_15, %c0_16] : memref<1x9x9x16xbf16, #tpu.memory_space<vmem>>, vector<1x4x8x16xbf16>
    %22 = vector.shape_cast %21 : vector<1x4x8x16xbf16> to vector<4x8x16xbf16>
    %23 = vector.shape_cast %22 : vector<4x8x16xbf16> to vector<32x16xbf16>
    %c1_17 = arith.constant 1 : index
    %c0_18 = arith.constant 0 : index
    %c0_19 = arith.constant 0 : index
    %c0_20 = arith.constant 0 : index
    %24 = vector.load %arg3[%c1_17, %c0_18, %c0_19, %c0_20] : memref<2x2x16x32xbf16, #tpu.memory_space<vmem>>, vector<1x1x16x32xbf16>
    %25 = vector.shape_cast %24 : vector<1x1x16x32xbf16> to vector<16x32xbf16>
    %cst_21 = arith.constant dense<0.000000e+00> : vector<32x32xf32>
    %26 = tpu.matmul %23, %25, %cst_21 {dimension_numbers = #tpu.dot_dimension_numbers<[1], [0], [0], [1], [0, 0, 1, 1], [], []>} : vector<32x16xbf16>, vector<16x32xbf16>, vector<32x32xf32> -> vector<32x32xf32>
    %27 = arith.addf %18, %26 : vector<32x32xf32>
    %c1_i32_22 = arith.constant 1 : i32
    %28 = arith.addi %1, %c1_i32_22 : i32
    %c0_23 = arith.constant 0 : index
    %29 = arith.index_cast %28 : i32 to index
    %c1_24 = arith.constant 1 : index
    %c0_25 = arith.constant 0 : index
    %30 = vector.load %arg2[%c0_23, %29, %c1_24, %c0_25] : memref<1x9x9x16xbf16, #tpu.memory_space<vmem>>, vector<1x4x8x16xbf16>
    %31 = vector.shape_cast %30 : vector<1x4x8x16xbf16> to vector<4x8x16xbf16>
    %32 = vector.shape_cast %31 : vector<4x8x16xbf16> to vector<32x16xbf16>
    %c1_26 = arith.constant 1 : index
    %c1_27 = arith.constant 1 : index
    %c0_28 = arith.constant 0 : index
    %c0_29 = arith.constant 0 : index
    %33 = vector.load %arg3[%c1_26, %c1_27, %c0_28, %c0_29] : memref<2x2x16x32xbf16, #tpu.memory_space<vmem>>, vector<1x1x16x32xbf16>
    %34 = vector.shape_cast %33 : vector<1x1x16x32xbf16> to vector<16x32xbf16>
    %cst_30 = arith.constant dense<0.000000e+00> : vector<32x32xf32>
    %35 = tpu.matmul %32, %34, %cst_30 {dimension_numbers = #tpu.dot_dimension_numbers<[1], [0], [0], [1], [0, 0, 1, 1], [], []>} : vector<32x16xbf16>, vector<16x32xbf16>, vector<32x32xf32> -> vector<32x32xf32>
    %36 = arith.addf %27, %35 : vector<32x32xf32>
    %c0_31 = arith.constant 0 : index
    %c0_32 = arith.constant 0 : index
    %37 = vector.load %arg4[%c0_31, %c0_32] : memref<1x32xf32, #tpu.memory_space<vmem>>, vector<1x32xf32>
    %38 = vector.broadcast %37 : vector<1x32xf32> to vector<32x32xf32>
    %39 = arith.addf %36, %38 : vector<32x32xf32>
    %40 = arith.truncf %39 : vector<32x32xf32> to vector<32x32xbf16>
    %c0_33 = arith.constant 0 : index
    %c0_34 = arith.constant 0 : index
    %c0_35 = arith.constant 0 : index
    %41 = vector.load %arg5[%c0_33, %c0_34, %c0_35] : memref<1x32x32xbf16, #tpu.memory_space<vmem>>, vector<1x32x32xbf16>
    %42 = vector.shape_cast %41 : vector<1x32x32xbf16> to vector<32x32xbf16>
    %43 = vector.shape_cast %40 : vector<32x32xbf16> to vector<1x32x32xbf16>
    tpu.vector_store %arg5[%c0_33, %c0_34, %c0_35], %43 {strides = array<i32>} : memref<1x32x32xbf16, #tpu.memory_space<vmem>>, vector<1x32x32xbf16>,
    %cst_36 = arith.constant dense<0.000000e+00> : vector<32xf32>
    %44 = vector.multi_reduction <add>, %39, %cst_36 [0] : vector<32x32xf32> to vector<32xf32>
    %45 = vector.shape_cast %44 : vector<32xf32> to vector<1x32xf32>
    %cst_37 = arith.constant 3.125000e-02 : f32
    %46 = vector.broadcast %cst_37 : f32 to vector<1x32xf32>
    %47 = arith.mulf %45, %46 : vector<1x32xf32>
    %48 = vector.broadcast %47 : vector<1x32xf32> to vector<32x32xf32>
    %49 = arith.subf %39, %48 : vector<32x32xf32>
    %c0_38 = arith.constant 0 : index
    %c0_39 = arith.constant 0 : index
    %c0_40 = arith.constant 0 : index
    %c0_41 = arith.constant 0 : index
    %50 = vector.load %arg6[%c0_38, %c0_39, %c0_40, %c0_41] : memref<1x1x2x32xf32, #tpu.memory_space<vmem>>, vector<1x1x1x32xf32>
    %51 = vector.shape_cast %50 : vector<1x1x1x32xf32> to vector<1x32xf32>
    %52 = vector.shape_cast %45 : vector<1x32xf32> to vector<1x1x1x32xf32>
    tpu.vector_store %arg6[%c0_38, %c0_39, %c0_40, %c0_41], %52 {strides = array<i32>} : memref<1x1x2x32xf32, #tpu.memory_space<vmem>>, vector<1x1x1x32xf32>,
    %53 = arith.mulf %49, %49 : vector<32x32xf32>
    %cst_42 = arith.constant dense<0.000000e+00> : vector<32xf32>
    %54 = vector.multi_reduction <add>, %53, %cst_42 [0] : vector<32x32xf32> to vector<32xf32>
    %55 = vector.shape_cast %54 : vector<32xf32> to vector<1x32xf32>
    %c0_43 = arith.constant 0 : index
    %c0_44 = arith.constant 0 : index
    %c1_45 = arith.constant 1 : index
    %c0_46 = arith.constant 0 : index
    %56 = vector.load %arg6[%c0_43, %c0_44, %c1_45, %c0_46] : memref<1x1x2x32xf32, #tpu.memory_space<vmem>>, vector<1x1x1x32xf32>
    %57 = vector.shape_cast %56 : vector<1x1x1x32xf32> to vector<1x32xf32>
    %58 = vector.shape_cast %55 : vector<1x32xf32> to vector<1x1x1x32xf32>
    tpu.vector_store %arg6[%c0_43, %c0_44, %c1_45, %c0_46], %58 {strides = array<i32>} : memref<1x1x2x32xf32, #tpu.memory_space<vmem>>, vector<1x1x1x32xf32>,
    return
  }
  func.func @transform_0(%arg0: i32, %arg1: i32) -> (i32, i32, i32, i32) {
    %c0_i32 = arith.constant 0 : i32
    %c0_i32_0 = arith.constant 0 : i32
    %c0_i32_1 = arith.constant 0 : i32
    %c0_i32_2 = arith.constant 0 : i32
    return %arg0, %c0_i32, %c0_i32_0, %c0_i32_1 : i32, i32, i32, i32
  }
  func.func @transform_1(%arg0: i32, %arg1: i32) -> (i32, i32, i32, i32) {
    %c0_i32 = arith.constant 0 : i32
    %c0_i32_0 = arith.constant 0 : i32
    %c0_i32_1 = arith.constant 0 : i32
    %c0_i32_2 = arith.constant 0 : i32
    %c0_i32_3 = arith.constant 0 : i32
    return %c0_i32, %c0_i32_0, %c0_i32_1, %c0_i32_2 : i32, i32, i32, i32
  }
  func.func @transform_2(%arg0: i32, %arg1: i32) -> (i32, i32) {
    %c0_i32 = arith.constant 0 : i32
    %c0_i32_0 = arith.constant 0 : i32
    %c0_i32_1 = arith.constant 0 : i32
    return %c0_i32, %c0_i32_0 : i32, i32
  }
  func.func @transform_3(%arg0: i32, %arg1: i32) -> (i32, i32, i32) {
    %c0_i32 = arith.constant 0 : i32
    %c0_i32_0 = arith.constant 0 : i32
    return %arg0, %arg1, %c0_i32 : i32, i32, i32
  }
  func.func @transform_4(%arg0: i32, %arg1: i32) -> (i32, i32, i32, i32) {
    %c0_i32 = arith.constant 0 : i32
    %c0_i32_0 = arith.constant 0 : i32
    %c0_i32_1 = arith.constant 0 : i32
    return %arg0, %arg1, %c0_i32, %c0_i32_0 : i32, i32, i32, i32
  }
}

module attributes {stable_mosaic.version = 11 : i64} {
  func.func @_cls_cond_kernel(%arg0: memref<2x8x8x32xbf16, #tpu.memory_space<vmem>>, %arg1: memref<1x1x1x32xf32, #tpu.memory_space<vmem>>, %arg2: memref<1x1x1x32xf32, #tpu.memory_space<vmem>>, %arg3: memref<2x4x4x32xf32, #tpu.memory_space<vmem>>, %arg4: memref<2x5x5xf32, #tpu.memory_space<vmem>>) attributes {dimension_semantics = [], scalar_prefetch = 0 : i64, scratch_operands = 0 : i64, tpu.core_type = #tpu.core_type<tc>} {
    %c0 = arith.constant 0 : index
    %c0_0 = arith.constant 0 : index
    %c0_1 = arith.constant 0 : index
    %c0_2 = arith.constant 0 : index
    %0 = vector.load %arg0[%c0, %c0_0, %c0_1, %c0_2] : memref<2x8x8x32xbf16, #tpu.memory_space<vmem>>, vector<2x8x8x32xbf16>
    %1 = arith.extf %0 : vector<2x8x8x32xbf16> to vector<2x8x8x32xf32>
    %c0_3 = arith.constant 0 : index
    %c0_4 = arith.constant 0 : index
    %c0_5 = arith.constant 0 : index
    %c0_6 = arith.constant 0 : index
    %2 = vector.load %arg1[%c0_3, %c0_4, %c0_5, %c0_6] : memref<1x1x1x32xf32, #tpu.memory_space<vmem>>, vector<1x1x1x32xf32>
    %3 = vector.broadcast %2 : vector<1x1x1x32xf32> to vector<2x8x8x32xf32>
    %4 = arith.mulf %1, %3 : vector<2x8x8x32xf32>
    %c0_7 = arith.constant 0 : index
    %c0_8 = arith.constant 0 : index
    %c0_9 = arith.constant 0 : index
    %c0_10 = arith.constant 0 : index
    %5 = vector.load %arg2[%c0_7, %c0_8, %c0_9, %c0_10] : memref<1x1x1x32xf32, #tpu.memory_space<vmem>>, vector<1x1x1x32xf32>
    %6 = vector.broadcast %5 : vector<1x1x1x32xf32> to vector<2x8x8x32xf32>
    %7 = arith.addf %4, %6 : vector<2x8x8x32xf32>
    %cst = arith.constant 0.000000e+00 : f32
    %8 = vector.broadcast %cst : f32 to vector<2x8x8x32xf32>
    %9 = arith.cmpf oge, %7, %8 : vector<2x8x8x32xf32>
    %cst_11 = arith.constant 2.000000e-01 : f32
    %10 = vector.broadcast %cst_11 : f32 to vector<2x8x8x32xf32>
    %11 = arith.mulf %10, %7 : vector<2x8x8x32xf32>
    %12 = arith.select %9, %7, %11 : vector<2x8x8x32xi1>, vector<2x8x8x32xf32>
    %c0_12 = arith.constant 0 : index
    %c0_13 = arith.constant 0 : index
    %c0_14 = arith.constant 0 : index
    %c0_15 = arith.constant 0 : index
    %13 = vector.load %arg3[%c0_12, %c0_13, %c0_14, %c0_15] : memref<2x4x4x32xf32, #tpu.memory_space<vmem>>, vector<2x4x4x32xf32>
    %cst_16 = arith.constant 0.000000e+00 : f32
    %14 = vector.broadcast %cst_16 : f32 to vector<2x5x5xf32>
    %15 = vector.extract_strided_slice %13 {offsets = [0, 0, 0, 0], sizes = [2, 1, 1, 32], strides = [1, 1, 1, 1]} : vector<2x4x4x32xf32> to vector<2x1x1x32xf32>
    %16 = vector.extract_strided_slice %12 {offsets = [0, 0, 0, 0], sizes = [2, 5, 5, 32], strides = [1, 1, 1, 1]} : vector<2x8x8x32xf32> to vector<2x5x5x32xf32>
    %17 = vector.broadcast %15 : vector<2x1x1x32xf32> to vector<2x5x5x32xf32>
    %18 = arith.mulf %16, %17 : vector<2x5x5x32xf32>
    %cst_17 = arith.constant dense<0.000000e+00> : vector<2x5x5xf32>
    %19 = vector.multi_reduction <add>, %18, %cst_17 [3] : vector<2x5x5x32xf32> to vector<2x5x5xf32>
    %20 = arith.addf %14, %19 : vector<2x5x5xf32>
    %21 = vector.extract_strided_slice %13 {offsets = [0, 0, 1, 0], sizes = [2, 1, 1, 32], strides = [1, 1, 1, 1]} : vector<2x4x4x32xf32> to vector<2x1x1x32xf32>
    %22 = vector.extract_strided_slice %12 {offsets = [0, 0, 1, 0], sizes = [2, 5, 5, 32], strides = [1, 1, 1, 1]} : vector<2x8x8x32xf32> to vector<2x5x5x32xf32>
    %23 = vector.broadcast %21 : vector<2x1x1x32xf32> to vector<2x5x5x32xf32>
    %24 = arith.mulf %22, %23 : vector<2x5x5x32xf32>
    %cst_18 = arith.constant dense<0.000000e+00> : vector<2x5x5xf32>
    %25 = vector.multi_reduction <add>, %24, %cst_18 [3] : vector<2x5x5x32xf32> to vector<2x5x5xf32>
    %26 = arith.addf %20, %25 : vector<2x5x5xf32>
    %27 = vector.extract_strided_slice %13 {offsets = [0, 0, 2, 0], sizes = [2, 1, 1, 32], strides = [1, 1, 1, 1]} : vector<2x4x4x32xf32> to vector<2x1x1x32xf32>
    %28 = vector.extract_strided_slice %12 {offsets = [0, 0, 2, 0], sizes = [2, 5, 5, 32], strides = [1, 1, 1, 1]} : vector<2x8x8x32xf32> to vector<2x5x5x32xf32>
    %29 = vector.broadcast %27 : vector<2x1x1x32xf32> to vector<2x5x5x32xf32>
    %30 = arith.mulf %28, %29 : vector<2x5x5x32xf32>
    %cst_19 = arith.constant dense<0.000000e+00> : vector<2x5x5xf32>
    %31 = vector.multi_reduction <add>, %30, %cst_19 [3] : vector<2x5x5x32xf32> to vector<2x5x5xf32>
    %32 = arith.addf %26, %31 : vector<2x5x5xf32>
    %33 = vector.extract_strided_slice %13 {offsets = [0, 0, 3, 0], sizes = [2, 1, 1, 32], strides = [1, 1, 1, 1]} : vector<2x4x4x32xf32> to vector<2x1x1x32xf32>
    %34 = vector.extract_strided_slice %12 {offsets = [0, 0, 3, 0], sizes = [2, 5, 5, 32], strides = [1, 1, 1, 1]} : vector<2x8x8x32xf32> to vector<2x5x5x32xf32>
    %35 = vector.broadcast %33 : vector<2x1x1x32xf32> to vector<2x5x5x32xf32>
    %36 = arith.mulf %34, %35 : vector<2x5x5x32xf32>
    %cst_20 = arith.constant dense<0.000000e+00> : vector<2x5x5xf32>
    %37 = vector.multi_reduction <add>, %36, %cst_20 [3] : vector<2x5x5x32xf32> to vector<2x5x5xf32>
    %38 = arith.addf %32, %37 : vector<2x5x5xf32>
    %39 = vector.extract_strided_slice %13 {offsets = [0, 1, 0, 0], sizes = [2, 1, 1, 32], strides = [1, 1, 1, 1]} : vector<2x4x4x32xf32> to vector<2x1x1x32xf32>
    %40 = vector.extract_strided_slice %12 {offsets = [0, 1, 0, 0], sizes = [2, 5, 5, 32], strides = [1, 1, 1, 1]} : vector<2x8x8x32xf32> to vector<2x5x5x32xf32>
    %41 = vector.broadcast %39 : vector<2x1x1x32xf32> to vector<2x5x5x32xf32>
    %42 = arith.mulf %40, %41 : vector<2x5x5x32xf32>
    %cst_21 = arith.constant dense<0.000000e+00> : vector<2x5x5xf32>
    %43 = vector.multi_reduction <add>, %42, %cst_21 [3] : vector<2x5x5x32xf32> to vector<2x5x5xf32>
    %44 = arith.addf %38, %43 : vector<2x5x5xf32>
    %45 = vector.extract_strided_slice %13 {offsets = [0, 1, 1, 0], sizes = [2, 1, 1, 32], strides = [1, 1, 1, 1]} : vector<2x4x4x32xf32> to vector<2x1x1x32xf32>
    %46 = vector.extract_strided_slice %12 {offsets = [0, 1, 1, 0], sizes = [2, 5, 5, 32], strides = [1, 1, 1, 1]} : vector<2x8x8x32xf32> to vector<2x5x5x32xf32>
    %47 = vector.broadcast %45 : vector<2x1x1x32xf32> to vector<2x5x5x32xf32>
    %48 = arith.mulf %46, %47 : vector<2x5x5x32xf32>
    %cst_22 = arith.constant dense<0.000000e+00> : vector<2x5x5xf32>
    %49 = vector.multi_reduction <add>, %48, %cst_22 [3] : vector<2x5x5x32xf32> to vector<2x5x5xf32>
    %50 = arith.addf %44, %49 : vector<2x5x5xf32>
    %51 = vector.extract_strided_slice %13 {offsets = [0, 1, 2, 0], sizes = [2, 1, 1, 32], strides = [1, 1, 1, 1]} : vector<2x4x4x32xf32> to vector<2x1x1x32xf32>
    %52 = vector.extract_strided_slice %12 {offsets = [0, 1, 2, 0], sizes = [2, 5, 5, 32], strides = [1, 1, 1, 1]} : vector<2x8x8x32xf32> to vector<2x5x5x32xf32>
    %53 = vector.broadcast %51 : vector<2x1x1x32xf32> to vector<2x5x5x32xf32>
    %54 = arith.mulf %52, %53 : vector<2x5x5x32xf32>
    %cst_23 = arith.constant dense<0.000000e+00> : vector<2x5x5xf32>
    %55 = vector.multi_reduction <add>, %54, %cst_23 [3] : vector<2x5x5x32xf32> to vector<2x5x5xf32>
    %56 = arith.addf %50, %55 : vector<2x5x5xf32>
    %57 = vector.extract_strided_slice %13 {offsets = [0, 1, 3, 0], sizes = [2, 1, 1, 32], strides = [1, 1, 1, 1]} : vector<2x4x4x32xf32> to vector<2x1x1x32xf32>
    %58 = vector.extract_strided_slice %12 {offsets = [0, 1, 3, 0], sizes = [2, 5, 5, 32], strides = [1, 1, 1, 1]} : vector<2x8x8x32xf32> to vector<2x5x5x32xf32>
    %59 = vector.broadcast %57 : vector<2x1x1x32xf32> to vector<2x5x5x32xf32>
    %60 = arith.mulf %58, %59 : vector<2x5x5x32xf32>
    %cst_24 = arith.constant dense<0.000000e+00> : vector<2x5x5xf32>
    %61 = vector.multi_reduction <add>, %60, %cst_24 [3] : vector<2x5x5x32xf32> to vector<2x5x5xf32>
    %62 = arith.addf %56, %61 : vector<2x5x5xf32>
    %63 = vector.extract_strided_slice %13 {offsets = [0, 2, 0, 0], sizes = [2, 1, 1, 32], strides = [1, 1, 1, 1]} : vector<2x4x4x32xf32> to vector<2x1x1x32xf32>
    %64 = vector.extract_strided_slice %12 {offsets = [0, 2, 0, 0], sizes = [2, 5, 5, 32], strides = [1, 1, 1, 1]} : vector<2x8x8x32xf32> to vector<2x5x5x32xf32>
    %65 = vector.broadcast %63 : vector<2x1x1x32xf32> to vector<2x5x5x32xf32>
    %66 = arith.mulf %64, %65 : vector<2x5x5x32xf32>
    %cst_25 = arith.constant dense<0.000000e+00> : vector<2x5x5xf32>
    %67 = vector.multi_reduction <add>, %66, %cst_25 [3] : vector<2x5x5x32xf32> to vector<2x5x5xf32>
    %68 = arith.addf %62, %67 : vector<2x5x5xf32>
    %69 = vector.extract_strided_slice %13 {offsets = [0, 2, 1, 0], sizes = [2, 1, 1, 32], strides = [1, 1, 1, 1]} : vector<2x4x4x32xf32> to vector<2x1x1x32xf32>
    %70 = vector.extract_strided_slice %12 {offsets = [0, 2, 1, 0], sizes = [2, 5, 5, 32], strides = [1, 1, 1, 1]} : vector<2x8x8x32xf32> to vector<2x5x5x32xf32>
    %71 = vector.broadcast %69 : vector<2x1x1x32xf32> to vector<2x5x5x32xf32>
    %72 = arith.mulf %70, %71 : vector<2x5x5x32xf32>
    %cst_26 = arith.constant dense<0.000000e+00> : vector<2x5x5xf32>
    %73 = vector.multi_reduction <add>, %72, %cst_26 [3] : vector<2x5x5x32xf32> to vector<2x5x5xf32>
    %74 = arith.addf %68, %73 : vector<2x5x5xf32>
    %75 = vector.extract_strided_slice %13 {offsets = [0, 2, 2, 0], sizes = [2, 1, 1, 32], strides = [1, 1, 1, 1]} : vector<2x4x4x32xf32> to vector<2x1x1x32xf32>
    %76 = vector.extract_strided_slice %12 {offsets = [0, 2, 2, 0], sizes = [2, 5, 5, 32], strides = [1, 1, 1, 1]} : vector<2x8x8x32xf32> to vector<2x5x5x32xf32>
    %77 = vector.broadcast %75 : vector<2x1x1x32xf32> to vector<2x5x5x32xf32>
    %78 = arith.mulf %76, %77 : vector<2x5x5x32xf32>
    %cst_27 = arith.constant dense<0.000000e+00> : vector<2x5x5xf32>
    %79 = vector.multi_reduction <add>, %78, %cst_27 [3] : vector<2x5x5x32xf32> to vector<2x5x5xf32>
    %80 = arith.addf %74, %79 : vector<2x5x5xf32>
    %81 = vector.extract_strided_slice %13 {offsets = [0, 2, 3, 0], sizes = [2, 1, 1, 32], strides = [1, 1, 1, 1]} : vector<2x4x4x32xf32> to vector<2x1x1x32xf32>
    %82 = vector.extract_strided_slice %12 {offsets = [0, 2, 3, 0], sizes = [2, 5, 5, 32], strides = [1, 1, 1, 1]} : vector<2x8x8x32xf32> to vector<2x5x5x32xf32>
    %83 = vector.broadcast %81 : vector<2x1x1x32xf32> to vector<2x5x5x32xf32>
    %84 = arith.mulf %82, %83 : vector<2x5x5x32xf32>
    %cst_28 = arith.constant dense<0.000000e+00> : vector<2x5x5xf32>
    %85 = vector.multi_reduction <add>, %84, %cst_28 [3] : vector<2x5x5x32xf32> to vector<2x5x5xf32>
    %86 = arith.addf %80, %85 : vector<2x5x5xf32>
    %87 = vector.extract_strided_slice %13 {offsets = [0, 3, 0, 0], sizes = [2, 1, 1, 32], strides = [1, 1, 1, 1]} : vector<2x4x4x32xf32> to vector<2x1x1x32xf32>
    %88 = vector.extract_strided_slice %12 {offsets = [0, 3, 0, 0], sizes = [2, 5, 5, 32], strides = [1, 1, 1, 1]} : vector<2x8x8x32xf32> to vector<2x5x5x32xf32>
    %89 = vector.broadcast %87 : vector<2x1x1x32xf32> to vector<2x5x5x32xf32>
    %90 = arith.mulf %88, %89 : vector<2x5x5x32xf32>
    %cst_29 = arith.constant dense<0.000000e+00> : vector<2x5x5xf32>
    %91 = vector.multi_reduction <add>, %90, %cst_29 [3] : vector<2x5x5x32xf32> to vector<2x5x5xf32>
    %92 = arith.addf %86, %91 : vector<2x5x5xf32>
    %93 = vector.extract_strided_slice %13 {offsets = [0, 3, 1, 0], sizes = [2, 1, 1, 32], strides = [1, 1, 1, 1]} : vector<2x4x4x32xf32> to vector<2x1x1x32xf32>
    %94 = vector.extract_strided_slice %12 {offsets = [0, 3, 1, 0], sizes = [2, 5, 5, 32], strides = [1, 1, 1, 1]} : vector<2x8x8x32xf32> to vector<2x5x5x32xf32>
    %95 = vector.broadcast %93 : vector<2x1x1x32xf32> to vector<2x5x5x32xf32>
    %96 = arith.mulf %94, %95 : vector<2x5x5x32xf32>
    %cst_30 = arith.constant dense<0.000000e+00> : vector<2x5x5xf32>
    %97 = vector.multi_reduction <add>, %96, %cst_30 [3] : vector<2x5x5x32xf32> to vector<2x5x5xf32>
    %98 = arith.addf %92, %97 : vector<2x5x5xf32>
    %99 = vector.extract_strided_slice %13 {offsets = [0, 3, 2, 0], sizes = [2, 1, 1, 32], strides = [1, 1, 1, 1]} : vector<2x4x4x32xf32> to vector<2x1x1x32xf32>
    %100 = vector.extract_strided_slice %12 {offsets = [0, 3, 2, 0], sizes = [2, 5, 5, 32], strides = [1, 1, 1, 1]} : vector<2x8x8x32xf32> to vector<2x5x5x32xf32>
    %101 = vector.broadcast %99 : vector<2x1x1x32xf32> to vector<2x5x5x32xf32>
    %102 = arith.mulf %100, %101 : vector<2x5x5x32xf32>
    %cst_31 = arith.constant dense<0.000000e+00> : vector<2x5x5xf32>
    %103 = vector.multi_reduction <add>, %102, %cst_31 [3] : vector<2x5x5x32xf32> to vector<2x5x5xf32>
    %104 = arith.addf %98, %103 : vector<2x5x5xf32>
    %105 = vector.extract_strided_slice %13 {offsets = [0, 3, 3, 0], sizes = [2, 1, 1, 32], strides = [1, 1, 1, 1]} : vector<2x4x4x32xf32> to vector<2x1x1x32xf32>
    %106 = vector.extract_strided_slice %12 {offsets = [0, 3, 3, 0], sizes = [2, 5, 5, 32], strides = [1, 1, 1, 1]} : vector<2x8x8x32xf32> to vector<2x5x5x32xf32>
    %107 = vector.broadcast %105 : vector<2x1x1x32xf32> to vector<2x5x5x32xf32>
    %108 = arith.mulf %106, %107 : vector<2x5x5x32xf32>
    %cst_32 = arith.constant dense<0.000000e+00> : vector<2x5x5xf32>
    %109 = vector.multi_reduction <add>, %108, %cst_32 [3] : vector<2x5x5x32xf32> to vector<2x5x5xf32>
    %110 = arith.addf %104, %109 : vector<2x5x5xf32>
    %c0_33 = arith.constant 0 : index
    %c0_34 = arith.constant 0 : index
    %c0_35 = arith.constant 0 : index
    %111 = vector.load %arg4[%c0_33, %c0_34, %c0_35] : memref<2x5x5xf32, #tpu.memory_space<vmem>>, vector<2x5x5xf32>
    tpu.vector_store %arg4[%c0_33, %c0_34, %c0_35], %110 {strides = array<i32>} : memref<2x5x5xf32, #tpu.memory_space<vmem>>, vector<2x5x5xf32>,
    return
  }
}

</mosaic_0001>

<bundles_post_ra>
// kernel: single_disc_cond_forward.2
= control target key start
LH: loop header
LB: loop body
LE: loop exit
PB: predicated region body
PF: predicated region fallthrough
CT: control target
= control target key end

     0   :  { %s1108_s15 = smov 0   ;;  %s1110_s16 = smov 0   ;;  %s1256_s0 = inlined_call_operand.vmem [shape: bf16[2,9,9,16], index: 0, kind: input, shape index: {}]   ;;  %s1257_s1 = inlined_call_operand.vmem [shape: bf16[2,2,16,32], index: 1, kind: input, shape index: {}]   ;;  %s1258_s2 = inlined_call_operand.vmem [shape: f32[1,32], index: 2, kind: input, shape index: {}]   ;;  %s1259_s3 = inlined_call_operand.vmem [shape: bf16[2,64,32], index: 3, kind: output, shape index: {0}]   ;;  %s1260_s4 = inlined_call_operand.vmem [shape: f32[2,2,2,32], index: 4, kind: output, shape index: {1}]  }
   0x1   :  { %s1112_s17 = smov 0   ;;  %s1114_s18 = smov 0  }
   0x2   :  { %s1116_s19 = smov 0  }
   0x3 LB: > { %s24_s20 = sadd.s32 1, %s1073_s17  ;;  %s27_s21 = sadd.s32 1, %s1077_s18  ;;  %s1081_s19 = sphi %s1116_s19, %s15_s19   ;;  %s1077_s18 = sphi %s1114_s18, %s1266_s18   ;;  %s1073_s17 = sphi %s1112_s17, %s1265_s17   ;;  %s1069_s16 = sphi %s1110_s16, %s1264_s16   ;;  %s1065_s15 = sphi %s1108_s15, %s1263_s15  }
   0x4   : > { %p25_p0 = scmp.ge.s32.totalorder %s24_s20, 2  ;;  %p894_p1 = scmp.ge.s32.totalorder %s1081_s19, 1 }
   0x5   : > { %p181_p2 = scmp.lt.s32.totalorder %s1081_s19, 5 }
   0x6   : > { %s1268_s20 = smov (%p25_p0, %s24_s20), 0  ;;  %s1270_s21 = smov (!%p25_p0, %s27_s21), %s1077_s18 }
   0x7   : > { %p182_p3 = pnand %p894_p1, %p181_p2  ;;  %p29_p4 = scmp.ge.s32.totalorder %s1270_s21, 2 }
   0x8   : > { %p219_p5 = scmp.lt.s32.totalorder (!%p182_p3), %s1069_s16, 1  ;;  %s952_s26 = sshll.u32 (!%p182_p3), %s1065_s15, 5 }
   0x9   : > { %s1272_s21 = smov (%p29_p4, %s1270_s21), 0  ;;  %185 = sbr.rel (%p182_p3) target bundleno = 293 (0x125), region = 32 }
   0xa   : > { %s896_s10 = sshll.u32 (!%p182_p3), %s1065_s15, 2  ;;  %p236_p7 = scmp.lt.s32.totalorder (!%p182_p3), %s1065_s15, 1 }
   0xb   : > { %p227_p6 = scmp.lt.s32.totalorder (!%p182_p3), %s896_s10, 7 }
   0xe   : > { %v1035_v0 = vld [vmem:[%s1257_s1] sm:$0xff]   ;;  %v1036_v1 = vld [vmem:[%s1257_s1 + $0x8] sm:$0xff]   ;;  %s1274_s16 = smov (!%p219_p5, %s1069_s16), 1  ;;  %v1153_v2 = vld [vmem:[%s1257_s1 + $0x10] sm:$0xff]   ;;  %vm331_vm0 = vcmask 130048   ;;  %s1276_s10 = smov (!%p227_p6, %s896_s10), 7 }
   0xf   : > { %976 = vmatprep.subr.bf16.mxu1 %v1035_v0  ;;  %970 = vmatprep.subr.bf16.mxu0 %v1036_v1  ;;  %s994_s27 = smul.u32 72, %s1274_s16  ;;  %v1040_v3 = vld [vmem:[%s1257_s1 + $0x18] sm:$0xff]   ;;  %vm257_vm1 = vsmask.f32 3328  ;;  %vm258_vm2 = vsmask.f32 7440 }
  0x10   : > { %977 = vmatpush3.bf16.msra.mxu1 %v1035_v0  ;;  %971 = vmatpush3.bf16.msra.mxu0 %v1036_v1  ;;  %vm1175_vm3 = vmor %vm257_vm1, %vm258_vm2  ;;  %s897_s11 = sshll.u32 %s1274_s16, 3  ;;  %vm709_vm4 = vcmask 257024   ;;  %vm714_vm5 = vcmask 261120   ;;  %s1278_s15 = smov (!%p236_p7, %s1065_s15), 1  ;;  %vm733_vm6 = vcmask 253952  }
  0x11   : > { %s223_s8 = scalar_lea.vmem %s1256_s0, %s994_s27  ;;  %982 = vmatprep.subr.bf16.mxu0 %v1153_v2  ;;  %988 = vmatprep.subr.bf16.mxu1 %v1040_v3  ;;  %s230_s12 = sadd.s32 %s897_s11, %s1276_s10 }
  0x12   : > { %s1162_s9 = scalar_lea.vmem %s223_s8, %s952_s26  ;;  %s898_s22 = sshll.u32 %s230_s12, 2 }
  0x13   : > { %v247_v4 = vld [vmem:[%s1162_s9] sm:$0xf]  ;;  %v248_v5 = vld [vmem:[%s1162_s9 + $0x8] sm:$0xf]  ;;  %v249_v6 = vld [vmem:[%s1162_s9 + $0x10] sm:$0xf]  ;;  %s232_s25 = scalar_lea.vmem %s1259_s3, %s898_s22 }
  0x14   : > { %v261_v7 = vshrl.u32 %v247_v4, 16  ;;  %v264_v8 = vshll.u32 %v247_v4, 16  ;;  %v275_v9 = vshrl.u32 %v248_v5, 16  ;;  %v278_v10 = vshll.u32 %v248_v5, 16  ;;  %v250_v11 = vld [vmem:[%s1162_s9 + $0x18] sm:$0xf] }
  0x15   : > { %v911_v12 = vcombine.low %v247_v4, %v248_v5  ;;  %v289_v13 = vshrl.u32 %v249_v6, 16  ;;  %v292_v14 = vshll.u32 %v249_v6, 16  ;;  %v303_v15 = vshrl.u32 %v250_v11, 16  ;;  %v253_v16 = vld [vmem:[%s1162_s9 + $0x4] sm:$0x1]  ;;  %s899_s26 = sshll.u32 %s1274_s16, 1 }
  0x16   : > { %v263_v17 = vrot.slane %v261_v7, 4  ;;  %v266_v18 = vrot.slane %v264_v8, 5  ;;  %v277_v19 = vrot.slane %v275_v9, 4  ;;  %v280_v20 = vrot.slane %v278_v10, 5  ;;  %v254_v21 = vld [vmem:[%s1162_s9 + $0xc] sm:$0x1]  ;;  %s239_s27 = sadd.s32 %s899_s26, %s1278_s15 }
  0x17   : > { %978 = vmatprep.mubr.msk.bf16.mxu1 %vm331_vm0, %v911_v12  ;;  %v291_v22 = vrot.slane %v289_v13, 4  ;;  %v294_v23 = vrot.slane %v292_v14, 5  ;;  %v305_v24 = vrot.slane %v303_v15, 4  ;;  %v306_v25 = vshll.u32 %v250_v11, 16  ;;  %v255_v26 = vld [vmem:[%s1162_s9 + $0x14] sm:$0x1] }
  0x18   : > { %v912_v27 = vcombine.low %v249_v6, %v250_v11  ;;  %v267_v28 = vor.u32 %v266_v18, %v263_v17  ;;  %v270_v29 = vshll.u32 %v253_v16, 16  ;;  %v281_v30 = vor.u32 %v280_v20, %v277_v19  ;;  %v256_v31 = vld [vmem:[%s1162_s9 + $0x1c] sm:$0x1]  ;;  %v929_v37 = vld [vmem:[%s1162_s9 + $0x8] sm:$0xf]  ;;  %s900_s28 = sshll.u32 %s239_s27, 1 }
  0x19   : > { %v308_v32 = vrot.slane %v306_v25, 5  ;;  %v284_v34 = vshll.u32 %v254_v21, 16  ;;  %v295_v35 = vor.u32 %v294_v23, %v291_v22  ;;  %v298_v36 = vshll.u32 %v255_v26, 16  ;;  %v930_v42 = vld [vmem:[%s1162_s9 + $0xc] sm:$0x1]  ;;  %s241_s5 = scalar_lea.vmem %s1260_s4, %s900_s28 }
  0x1a   : > { %979 = vmatmul.mubr.msk.bf16.vlgmr.msra.gmra.mxu1 %vm331_vm0, %v912_v27  ;;  %v268_v38 = vrot.slane %v267_v28, 4  ;;  %v272_v39 = vrot.slane %v270_v29, 5  ;;  %v282_v40 = vrot.slane %v281_v30, 4  ;;  %v312_v41 = vshll.u32 %v256_v31, 16  ;;  %v931_v47 = vld [vmem:[%s1162_s9 + $0x10] sm:$0xf] }
  0x1b   : > { %v286_v43 = vrot.slane %v284_v34, 5  ;;  %v296_v44 = vrot.slane %v295_v35, 4  ;;  %v300_v45 = vrot.slane %v298_v36, 5  ;;  %v309_v46 = vor.u32 %v308_v32, %v305_v24  ;;  %989 = vmatpush3.bf16.msra.mxu1 %v1040_v3  ;;  %v932_v50 = vld [vmem:[%s1162_s9 + $0x14] sm:$0x1] }
  0x1c   : > { %v273_v48 = vsel %vm1175_vm3, %v268_v38, %v272_v39  ;;  %v314_v49 = vrot.slane %v312_v41, 5  ;;  %v553_v51 = vshrl.u32 %v929_v37, 16  ;;  %v556_v52 = vshll.u32 %v929_v37, 16  ;;  %v933_v57 = vld [vmem:[%s1162_s9 + $0x18] sm:$0xf] }
  0x1d   : > { %v287_v53 = vsel %vm1175_vm3, %v282_v40, %v286_v43  ;;  %v301_v54 = vsel %vm1175_vm3, %v296_v44, %v300_v45  ;;  %v310_v55 = vrot.slane %v309_v46, 4  ;;  %v562_v56 = vshll.u32 %v930_v42, 16  ;;  %v934_v58 = vld [vmem:[%s1162_s9 + $0x1c] sm:$0x1]  ;;  %v935_v63 = vld [vmem:[%s1162_s9 + $0x20] sm:$0xf] }
  0x1e   : > { %v906_v59 = vcombine.low %v273_v48, %v287_v53  ;;  %v555_v60 = vrot.slane %v553_v51, 4  ;;  %v558_v61 = vrot.slane %v556_v52, 5  ;;  %v567_v62 = vshrl.u32 %v931_v47, 16  ;;  %v936_v4 = vld [vmem:[%s1162_s9 + $0x24] sm:$0x1] }
  0x1f   : > { %v315_v0 = vsel %vm1175_vm3, %v310_v55, %v314_v49  ;;  %v570_v1 = vshll.u32 %v931_v47, 16  ;;  %v576_v3 = vshll.u32 %v932_v50, 16  ;;  %v581_v8 = vshrl.u32 %v933_v57, 16  ;;  %v1041_v9 = vld [vmem:[%s1162_s9 + $0x8] ss:$8 sps:$4 sm:$0xff]  }
  0x20   : > { %972 = vmatprep.mubr.msk.bf16.mxu0 %vm331_vm0, %v906_v59  ;;  %v907_v5 = vcombine.low %v301_v54, %v315_v0  ;;  %v559_v6 = vor.u32 %v558_v61, %v555_v60  ;;  %v569_v7 = vrot.slane %v567_v62, 4  ;;  %v564_v10 = vrot.slane %v562_v56, 5  ;;  %v1042_v30 = vld [vmem:[%s1162_s9 + $0x18] ss:$8 sps:$4 sm:$0xff]  }
  0x21   : > { %v572_v11 = vrot.slane %v570_v1, 5  ;;  %v584_v12 = vshll.u32 %v933_v57, 16  ;;  %v590_v13 = vshll.u32 %v934_v58, 16  ;;  %v583_v15 = vrot.slane %v581_v8, 4  ;;  %v944_v52 = vld [vmem:[%s1258_s2] ss:$0 sm:$0xff] }
  0x22   : > { %973 = vmatmul.mubr.msk.bf16.vlgmr.msra.gmra.mxu0 %vm331_vm0, %v907_v5  ;;  %v560_v14 = vrot.slane %v559_v6, 4  ;;  %v595_v16 = vshrl.u32 %v935_v63, 16  ;;  %v598_v17 = vshll.u32 %v935_v63, 16  ;;  %v578_v19 = vrot.slane %v576_v3, 5 }
  0x23   : > { %983 = vmatpush3.bf16.msra.mxu0 %v1153_v2  ;;  %v573_v18 = vor.u32 %v572_v11, %v569_v7  ;;  %v586_v20 = vrot.slane %v584_v12, 5  ;;  %v604_v21 = vshll.u32 %v936_v4, 16  ;;  %984 = vmatprep.mubr.msk.bf16.mxu0 %vm331_vm0, %v1041_v9  ;;  %v592_v27 = vrot.slane %v590_v13, 5 }
  0x24   : > { %v597_v22 = vrot.slane %v595_v16, 4  ;;  %v600_v23 = vrot.slane %v598_v17, 5  ;;  %v565_v24 = vsel %vm1175_vm3, %v560_v14, %v564_v10 }
  0x25   : > { %v574_v25 = vrot.slane %v573_v18, 4  ;;  %v587_v26 = vor.u32 %v586_v20, %v583_v15  ;;  %v606_v29 = vrot.slane %v604_v21, 5 }
  0x26   : > { %v601_v28 = vor.u32 %v600_v23, %v597_v22 }
  0x27   : > { %v579_v2 = vsel %vm1175_vm3, %v574_v25, %v578_v19  ;;  %v588_v31 = vrot.slane %v587_v26, 4 }
  0x28   : > { %v939_v32 = vcombine.low %v565_v24, %v579_v2  ;;  %v602_v34 = vrot.slane %v601_v28, 4 }
  0x29   : > { %v593_v35 = vsel %vm1175_vm3, %v588_v31, %v592_v27 }
  0x2a   : > { %990 = vmatprep.mubr.msk.bf16.mxu1 %vm331_vm0, %v939_v32  ;;  %v607_v36 = vsel %vm1175_vm3, %v602_v34, %v606_v29  ;;  %985 = vmatmul.mubr.msk.bf16.vlgmr.msra.gmra.mxu0 %vm331_vm0, %v1042_v30 }
  0x2b   : > { %v940_v37 = vcombine.low %v593_v35, %v607_v36 }
  0x2d   : > { %991 = vmatmul.mubr.msk.bf16.vlgmr.msra.gmra.mxu1 %vm331_vm0, %v940_v37 }
  0xda   : > { %v980_v38 = vpop.f32.mrf.mxu1 }
  0xdc   : > { %v443_v39 = vpop.f32.mrf.mxu1 }
  0xde   : > { %v981_v42 = vpop.f32.mrf.mxu1 }
  0xe0   : > { %v446_v46 = vpop.f32.mrf.mxu1 }
  0xe2   : > { %v974_v40 = vpop.f32.mrf.mxu0 }
  0xe3   : > { %v452_v45 = vadd.f32 %v980_v38, %v974_v40 }
  0xe4   : > { %v372_v41 = vpop.f32.mrf.mxu0 }
  0xe5   : > { %v444_v47 = vadd.f32 %v443_v39, %v372_v41 }
  0xe6   : > { %v975_v43 = vpop.f32.mrf.mxu0 }
  0xe7   : > { %v455_v50 = vadd.f32 %v981_v42, %v975_v43 }
  0xe8   : > { %v375_v44 = vpop.f32.mrf.mxu0 }
  0xe9   : > { %v447_v56 = vadd.f32 %v446_v46, %v375_v44 }
  0xea   : > { %v986_v33 = vpop.f32.mrf.mxu0 }
  0xeb   : > { %v542_v48 = vadd.f32 %v986_v33, %v452_v45 }
  0xec   : > { %v525_v49 = vpop.f32.mrf.mxu0 }
  0xed   : > { %v992_v51 = vpop.f32.mrf.mxu1  ;;  %v540_v53 = vadd.f32 %v525_v49, %v444_v47 }
  0xee   : > { %v680_v54 = vadd.f32 %v992_v51, %v542_v48  ;;  %v987_v55 = vpop.f32.mrf.mxu0 }
  0xef   : > { %v663_v57 = vpop.f32.mrf.mxu1  ;;  %v543_v58 = vadd.f32 %v987_v55, %v455_v50 }
  0xf0   : > { %v691_v59 = vadd.f32 %v944_v52, %v680_v54  ;;  %v678_v60 = vadd.f32 %v663_v57, %v540_v53  ;;  %v528_v61 = vpop.f32.mrf.mxu0 }
  0xf1   : > { %v993_v62 = vpop.f32.mrf.mxu1  ;;  %v541_v63 = vadd.f32 %v528_v61, %v447_v56 }
  0xf2   : > { %v956_v0 = vpack.c.bf16 %v691_v59, %v691_v59  ;;  %v689_v1 = vadd.f32 %v944_v52, %v678_v60  ;;  %v681_v3 = vadd.f32 %v993_v62, %v543_v58  ;;  %v718_v14 = vsel %vm714_vm5, %v691_v59, 0.0 }
  0xf3   : > { %v666_v4 = vpop.f32.mrf.mxu1 }
  0xf4   : > { %712 = vst.msk [vmem:[%s232_s25 + $0x8] sm:$0xf] %vm709_vm4, %v956_v0  ;;  %v954_v5 = vpack.c.bf16 %v689_v1, %v689_v1  ;;  %v692_v6 = vadd.f32 %v944_v52, %v681_v3  ;;  %v679_v7 = vadd.f32 %v666_v4, %v541_v63  ;;  %v715_v10 = vsel %vm714_vm5, %v689_v1, 0.0 }
  0xf6   : > { %710 = vst.msk [vmem:[%s232_s25] sm:$0xf] %vm709_vm4, %v954_v5  ;;  %v957_v8 = vpack.c.bf16 %v692_v6, %v692_v6  ;;  %v690_v9 = vadd.f32 %v944_v52, %v679_v7  ;;  %v720_v16 = vsel %vm714_vm5, %v692_v6, 0.0 }
  0xf8   : > { %713 = vst.msk [vmem:[%s232_s25 + $0xc] sm:$0xf] %vm709_vm4, %v957_v8  ;;  %v955_v11 = vpack.c.bf16 %v690_v9, %v690_v9  ;;  %v716_v12 = vsel %vm714_vm5, %v690_v9, 0.0 }
  0xf9   : > { %v717_v13 = vadd.f32 %v716_v12, %v715_v10 }
  0xfa   : > { %711 = vst.msk [vmem:[%s232_s25 + $0x4] sm:$0xf] %vm709_vm4, %v955_v11 }
  0xfb   : > { %v719_v15 = vadd.f32 %v718_v14, %v717_v13 }
  0xfd   : > { %v721_v17 = vadd.f32 %v720_v16, %v719_v15 }
  0xff   : > { %v722_v18 = vrot.slane %v721_v17, 4 }
 0x101   : > { %v723_v19 = vadd.f32 %v722_v18, %v721_v17 }
 0x103   : > { %v724_v20 = vrot.slane %v723_v19, 2 }
 0x105   : > { %v725_v21 = vadd.f32 %v724_v20, %v723_v19 }
 0x107   : > { %v726_v22 = vrot.slane %v725_v21, 1 }
 0x109   : > { %v727_v23 = vadd.f32 %v726_v22, %v725_v21 }
 0x10b   : > { %v728_v24 = vmul.f32 0.03125, %v727_v23  ;;  %734 = vst.msk [vmem:[%s241_s5] sm:$0x1] %vm733_vm6, %v727_v23 }
 0x10d   : > { %v729_v25 = vsub.f32 %v689_v1, %v728_v24  ;;  %v730_v26 = vsub.f32 %v690_v9, %v728_v24  ;;  %v731_v27 = vsub.f32 %v691_v59, %v728_v24  ;;  %v732_v28 = vsub.f32 %v692_v6, %v728_v24 }
 0x10f   : > { %v735_v29 = vmul.f32 %v729_v25, %v729_v25  ;;  %v736_v30 = vmul.f32 %v730_v26, %v730_v26  ;;  %v737_v2 = vmul.f32 %v731_v27, %v731_v27  ;;  %v738_v31 = vmul.f32 %v732_v28, %v732_v28 }
 0x111   : > { %v739_v32 = vsel %vm714_vm5, %v735_v29, 0.0  ;;  %v740_v34 = vsel %vm714_vm5, %v736_v30, 0.0  ;;  %v742_v36 = vsel %vm714_vm5, %v737_v2, 0.0  ;;  %v744_v38 = vsel %vm714_vm5, %v738_v31, 0.0 }
 0x112   : > { %v741_v35 = vadd.f32 %v740_v34, %v739_v32 }
 0x114   : > { %v743_v37 = vadd.f32 %v742_v36, %v741_v35 }
 0x116   : > { %v745_v39 = vadd.f32 %v744_v38, %v743_v37 }
 0x118   : > { %v746_v40 = vrot.slane %v745_v39, 4 }
 0x11a   : > { %v747_v41 = vadd.f32 %v746_v40, %v745_v39 }
 0x11c   : > { %v748_v42 = vrot.slane %v747_v41, 2 }
 0x11e   : > { %v749_v43 = vadd.f32 %v748_v42, %v747_v41 }
 0x120   : > { %v750_v44 = vrot.slane %v749_v43, 1 }
 0x122   : > { %v751_v45 = vadd.f32 %v750_v44, %v749_v43 }
 0x124   : > { %752 = vst.msk [vmem:[%s241_s5 + $0x1] sm:$0x1] %vm733_vm6, %v751_v45 }
 0x125 PF: > { %s15_s19 = sadd.s32 1, %s1081_s19   ;;  %s1263_s15 = smov %s1073_s17 }
 0x126   : > { %p12_p8 = scmp.ge.s32.totalorder %s15_s19, 6   ;;  %s1264_s16 = smov %s1077_s18 }
 0x127   : > { %s1265_s17 = smov %s1268_s20  ;;  %s1266_s18 = smov %s1272_s21 }
 0x128   :  { %14 = sbr.rel (!%p12_p8) target bundleno = 3 (0x3), region = 79 }

// kernel: single_disc_cond_forward.3
= control target key start
LH: loop header
LB: loop body
LE: loop exit
PB: predicated region body
PF: predicated region fallthrough
CT: control target
= control target key end

     0   :  { %v151_v0 = vlaneseq  ;;  %vm169_vm0 = vcmask 258048   ;;  %vm228_vm11 = vcmask 259073   ;;  %vm317_vm12 = vcmask 260098   ;;  %s2451_s0 = inlined_call_operand.vmem [shape: bf16[2,8,8,32], index: 0, kind: input, shape index: {}]   ;;  %s2452_s1 = inlined_call_operand.vmem [shape: f32[1,1,1,32], index: 1, kind: input, shape index: {}]   ;;  %s2453_s2 = inlined_call_operand.vmem [shape: f32[1,1,1,32], index: 2, kind: input, shape index: {}]   ;;  %s2454_s3 = inlined_call_operand.vmem [shape: f32[2,4,4,32], index: 3, kind: input, shape index: {}]   ;;  %s2455_s4 = inlined_call_operand.vmem [shape: f32[2,5,5], index: 4, kind: output, shape index: {}]  }
   0x1   :  { %v1580_v1 = vld [vmem:[%s2451_s0 + $0x8] sm:$0xff]   ;;  %v1624_v2 = vld [vmem:[%s2452_s1] ss:$0 sm:$0xff]  ;;  %v1648_v14 = vld [vmem:[%s2454_s3 + $0x10] sm:$0xf]  ;;  %vm406_vm13 = vcmask 261123  }
   0x2   :  { %v1554_v3 = vunpack.c.l.bf16 %v1580_v1  ;;  %v1555_v4 = vunpack.c.h.bf16 %v1580_v1  ;;  %v1629_v5 = vld [vmem:[%s2453_s2] ss:$0 sm:$0xff]  ;;  %v1632_v6 = vshrl.u32 %v151_v0, 7  ;;  %v1653_v15 = vld [vmem:[%s2451_s0 + $0x10] sm:$0xff]   ;;  %v1584_v39 = vld [vmem:[%s2451_s0 + $0x28] sm:$0xff]  }
   0x3   :  { %v1549_v7 = vld [vmem:[%s2451_s0] sm:$0xff]   ;;  %v1558_v19 = vunpack.c.l.bf16 %v1653_v15  ;;  %v1570_v50 = vunpack.c.l.bf16 %v1584_v39  ;;  %v1700_v51 = vld [vmem:[%s2451_s0 + $0x30] sm:$0xff]   ;;  %v1571_v55 = vunpack.c.h.bf16 %v1584_v39 }
   0x4   :  { %v1583_v8 = vld [vmem:[%s2451_s0 + $0x20] sm:$0xff]   ;;  %v1550_v10 = vunpack.c.l.bf16 %v1549_v7  ;;  %v1551_v11 = vunpack.c.h.bf16 %v1549_v7  ;;  %v58_v16 = vmul.f32 %v1554_v3, %v1624_v2  ;;  %v59_v17 = vmul.f32 %v1555_v4, %v1624_v2 }
   0x5   :  { %v1643_v9 = vld [vmem:[%s2454_s3] sm:$0xf]  ;;  %v1566_v12 = vunpack.c.l.bf16 %v1583_v8  ;;  %v1567_v13 = vunpack.c.h.bf16 %v1583_v8  ;;  %v1658_v18 = vsub.s32 0, %v1632_v6  ;;  %v60_v47 = vmul.f32 %v1558_v19, %v1624_v2 }
   0x6   :  { %v56_v20 = vmul.f32 %v1550_v10, %v1624_v2  ;;  %v57_v21 = vmul.f32 %v1551_v11, %v1624_v2  ;;  %v81_v24 = vadd.f32 %v1629_v5, %v58_v16  ;;  %v82_v25 = vadd.f32 %v1629_v5, %v59_v17 }
   0x7   :  { %v64_v22 = vmul.f32 %v1566_v12, %v1624_v2  ;;  %v65_v23 = vmul.f32 %v1567_v13, %v1624_v2  ;;  %v154_v26 = vrot.slane %v1643_v9, %v1658_v18  ;;  %v1671_v27 = vrot.slane %v1648_v14, %v1658_v18 }
   0x8   :  { %v79_v28 = vadd.f32 %v1629_v5, %v56_v20  ;;  %v80_v29 = vadd.f32 %v1629_v5, %v57_v21  ;;  %vm97_vm1 = vcmp.ge.f32.partialorder %v81_v24, 0.0  ;;  %vm98_vm2 = vcmp.ge.f32.partialorder %v82_v25, 0.0 }
   0x9   :  { %v87_v30 = vadd.f32 %v1629_v5, %v64_v22  ;;  %v88_v31 = vadd.f32 %v1629_v5, %v65_v23  ;;  %v113_v32 = vmul.f32 0.2, %v81_v24  ;;  %v114_v33 = vmul.f32 0.2, %v82_v25 }
   0xa   :  { %vm95_vm3 = vcmp.ge.f32.partialorder %v79_v28, 0.0  ;;  %v111_v34 = vmul.f32 0.2, %v79_v28  ;;  %vm96_vm4 = vcmp.ge.f32.partialorder %v80_v29, 0.0  ;;  %v112_v35 = vmul.f32 0.2, %v80_v29 }
   0xb   :  { %v1677_v36 = vsel %vm97_vm1, %v81_v24, %v113_v32  ;;  %v1679_v37 = vsel %vm98_vm2, %v82_v25, %v114_v33  ;;  %vm103_vm5 = vcmp.ge.f32.partialorder %v87_v30, 0.0  ;;  %v119_v38 = vmul.f32 0.2, %v87_v30 }
   0xc   :  { %v161_v40 = vmul.f32 %v154_v26, %v1677_v36  ;;  %v1685_v41 = vsel %vm95_vm3, %v79_v28, %v111_v34  ;;  %v162_v42 = vmul.f32 %v154_v26, %v1679_v37  ;;  %v1688_v43 = vsel %vm96_vm4, %v80_v29, %v112_v35 }
   0xd   :  { %v159_v44 = vmul.f32 %v154_v26, %v1685_v41  ;;  %v160_v45 = vmul.f32 %v154_v26, %v1688_v43  ;;  %v1692_v46 = vsel %vm103_vm5, %v87_v30, %v119_v38  ;;  %v83_v54 = vadd.f32 %v1629_v5, %v60_v47 }
   0xe   :  { %v176_v48 = vsel %vm169_vm0, %v161_v40, 0.0  ;;  %v179_v49 = vsel %vm169_vm0, %v162_v42, 0.0  ;;  %v164_v53 = vmul.f32 %v1671_v27, %v1692_v46  ;;  %v66_v57 = vmul.f32 %v1570_v50, %v1624_v2 }
   0xf   :  { %177 = vadd.xlane.f32.xlu1 %v176_v48  ;;  %v170_v52 = vsel %vm169_vm0, %v159_v44, 0.0  ;;  %v173_v56 = vsel %vm169_vm0, %v160_v45, 0.0  ;;  %vm104_vm6 = vcmp.ge.f32.partialorder %v88_v31, 0.0  ;;  %v120_v58 = vmul.f32 0.2, %v88_v31 }
  0x10   :  { %171 = vadd.xlane.f32.xlu0 %v170_v52  ;;  %vm99_vm7 = vcmp.ge.f32.partialorder %v83_v54, 0.0  ;;  %v115_v59 = vmul.f32 0.2, %v83_v54  ;;  %v67_v60 = vmul.f32 %v1571_v55, %v1624_v2  ;;  %v1574_v61 = vunpack.c.l.bf16 %v1700_v51 }
  0x11   :  { %v89_v62 = vadd.f32 %v1629_v5, %v66_v57  ;;  %v1711_v63 = vsel %vm104_vm6, %v88_v31, %v120_v58  ;;  %v185_v1 = vsel %vm169_vm0, %v164_v53, 0.0  ;;  %v1720_v11 = vsub.s32 1, %v1632_v6 }
  0x12   :  { %v1714_v3 = vsel %vm99_vm7, %v83_v54, %v115_v59  ;;  %v90_v4 = vadd.f32 %v1629_v5, %v67_v60  ;;  %v68_v7 = vmul.f32 %v1574_v61, %v1624_v2  ;;  %v165_v13 = vmul.f32 %v1671_v27, %v1711_v63 }
  0x13   :  { %180 = vadd.xlane.f32.xlu1 %v179_v49  ;;  %v163_v8 = vmul.f32 %v154_v26, %v1714_v3  ;;  %vm105_vm8 = vcmp.ge.f32.partialorder %v89_v62, 0.0  ;;  %v121_v10 = vmul.f32 0.2, %v89_v62  ;;  %v213_v23 = vrot.slane %v1643_v9, %v1720_v11 }
  0x14   :  { %174 = vadd.xlane.f32.xlu0 %v173_v56  ;;  %vm106_vm9 = vcmp.ge.f32.partialorder %v90_v4, 0.0  ;;  %v122_v12 = vmul.f32 0.2, %v90_v4  ;;  %v91_v16 = vadd.f32 %v1629_v5, %v68_v7  ;;  %v188_v25 = vsel %vm169_vm0, %v165_v13, 0.0 }
  0x15   :  { %v182_v17 = vsel %vm169_vm0, %v163_v8, 0.0  ;;  %v1726_v19 = vsel %vm105_vm8, %v89_v62, %v121_v10  ;;  %v219_v31 = vmul.f32 %v213_v23, %v1688_v43  ;;  %v218_v33 = vmul.f32 %v213_v23, %v1685_v41 }
  0x16   :  { %v1728_v20 = vsel %vm106_vm9, %v90_v4, %v122_v12  ;;  %v166_v21 = vmul.f32 %v1671_v27, %v1726_v19  ;;  %vm107_vm10 = vcmp.ge.f32.partialorder %v91_v16, 0.0  ;;  %v123_v22 = vmul.f32 0.2, %v91_v16 }
  0x17   :  { %186 = vadd.xlane.f32.xlu1 %v185_v1  ;;  %v167_v28 = vmul.f32 %v1671_v27, %v1728_v20  ;;  %v232_v34 = vsel %vm228_vm11, %v219_v31, 0.0  ;;  %v221_v35 = vmul.f32 %v213_v23, %v1679_v37  ;;  %v229_v38 = vsel %vm228_vm11, %v218_v33, 0.0 }
  0x18   :  { %183 = vadd.xlane.f32.xlu0 %v182_v17  ;;  %v191_v24 = vsel %vm169_vm0, %v166_v21, 0.0  ;;  %v1736_v26 = vsel %vm107_vm10, %v91_v16, %v123_v22  ;;  %v220_v39 = vmul.f32 %v213_v23, %v1677_v36  ;;  %v222_v45 = vmul.f32 %v213_v23, %v1714_v3 }
  0x19   :  { %v168_v29 = vmul.f32 %v1671_v27, %v1736_v26  ;;  %v194_v32 = vsel %vm169_vm0, %v167_v28, 0.0  ;;  %v217_v27 = vrot.slane %v1648_v14, %v1720_v11  ;;  %v238_v40 = vsel %vm228_vm11, %v221_v35, 0.0 }
  0x1a   :  { %v235_v44 = vsel %vm228_vm11, %v220_v39, 0.0  ;;  %v1759_v49 = vsub.s32 2, %v1632_v6  ;;  %v241_v50 = vsel %vm228_vm11, %v222_v45, 0.0  ;;  %v1786_v22 = vsub.s32 3, %v1632_v6 }
  0x1b   :  { %192 = vadd.xlane.f32.xlu1 %v191_v24  ;;  %v197_v30 = vsel %vm169_vm0, %v168_v29, 0.0  ;;  %v223_v42 = vmul.f32 %v217_v27, %v1692_v46  ;;  %v225_v48 = vmul.f32 %v217_v27, %v1726_v19  ;;  %v224_v52 = vmul.f32 %v217_v27, %v1711_v63 }
  0x1c   :  { %189 = vadd.xlane.f32.xlu0 %v188_v25  ;;  %v227_v54 = vmul.f32 %v217_v27, %v1736_v26  ;;  %v302_v55 = vrot.slane %v1643_v9, %v1759_v49  ;;  %v226_v57 = vmul.f32 %v217_v27, %v1728_v20  ;;  %v306_v4 = vrot.slane %v1648_v14, %v1759_v49 }
  0x1d   :  { %v244_v47 = vsel %vm228_vm11, %v223_v42, 0.0  ;;  %v250_v53 = vsel %vm228_vm11, %v225_v48, 0.0  ;;  %v247_v56 = vsel %vm228_vm11, %v224_v52, 0.0  ;;  %v391_v29 = vrot.slane %v1643_v9, %v1786_v22 }
  0x1e   :  { %v256_v58 = vsel %vm228_vm11, %v227_v54, 0.0  ;;  %v308_v59 = vmul.f32 %v302_v55, %v1688_v43  ;;  %v253_v60 = vsel %vm228_vm11, %v226_v57, 0.0  ;;  %v307_v61 = vmul.f32 %v302_v55, %v1685_v41 }
  0x1f   :  { %198 = vadd.xlane.f32.xlu1 %v197_v30  ;;  %v310_v1 = vmul.f32 %v302_v55, %v1679_v37  ;;  %v309_v8 = vmul.f32 %v302_v55, %v1677_v36  ;;  %v312_v12 = vmul.f32 %v306_v4, %v1692_v46  ;;  %v311_v16 = vmul.f32 %v302_v55, %v1714_v3 }
  0x20   :  { %195 = vadd.xlane.f32.xlu0 %v194_v32  ;;  %v321_v62 = vsel %vm317_vm12, %v308_v59, 0.0  ;;  %v318_v7 = vsel %vm317_vm12, %v307_v61, 0.0  ;;  %v314_v21 = vmul.f32 %v306_v4, %v1726_v19  ;;  %v313_v24 = vmul.f32 %v306_v4, %v1711_v63 }
  0x21   :  { %v327_v10 = vsel %vm317_vm12, %v310_v1, 0.0  ;;  %v324_v13 = vsel %vm317_vm12, %v309_v8, 0.0  ;;  %v333_v17 = vsel %vm317_vm12, %v312_v12, 0.0  ;;  %v330_v23 = vsel %vm317_vm12, %v311_v16, 0.0 }
  0x22   :  { %v339_v25 = vsel %vm317_vm12, %v314_v21, 0.0  ;;  %v316_v28 = vmul.f32 %v306_v4, %v1736_v26  ;;  %v336_v30 = vsel %vm317_vm12, %v313_v24, 0.0  ;;  %v315_v31 = vmul.f32 %v306_v4, %v1728_v20  ;;  %v1836_v4 = vld [vmem:[%s2454_s3 + $0x14] sm:$0xf] }
  0x23   :  { %233 = vadd.xlane.f32.xlu1 %v232_v34  ;;  %v397_v33 = vmul.f32 %v391_v29, %v1688_v43  ;;  %v396_v35 = vmul.f32 %v391_v29, %v1685_v41  ;;  %v399_v9 = vmul.f32 %v391_v29, %v1679_v37  ;;  %v400_v45 = vmul.f32 %v391_v29, %v1714_v3 }
  0x24   :  { %230 = vadd.xlane.f32.xlu0 %v229_v38  ;;  %v345_v32 = vsel %vm317_vm12, %v316_v28, 0.0  ;;  %v342_v34 = vsel %vm317_vm12, %v315_v31, 0.0  ;;  %v395_v38 = vrot.slane %v1648_v14, %v1786_v22  ;;  %v484_v12 = vrot.slane %v1836_v4, %v1658_v18 }
  0x25   :  { %v410_v27 = vsel %vm406_vm13, %v397_v33, 0.0  ;;  %v407_v39 = vsel %vm406_vm13, %v396_v35, 0.0  ;;  %v416_v42 = vsel %vm406_vm13, %v399_v9, 0.0  ;;  %vm1527_vm5 = vcmask 1042434  }
  0x26   :  { %v403_v48 = vmul.f32 %v395_v38, %v1726_v19  ;;  %v402_v52 = vmul.f32 %v395_v38, %v1711_v63  ;;  %v405_v54 = vmul.f32 %v395_v38, %v1736_v26  ;;  %v404_v57 = vmul.f32 %v395_v38, %v1728_v20 }
  0x27   :  { %239 = vadd.xlane.f32.xlu1 %v238_v40  ;;  %v398_v40 = vmul.f32 %v391_v29, %v1677_v36  ;;  %v490_v24 = vmul.f32 %v484_v12, %v1711_v63  ;;  %v492_v31 = vmul.f32 %v484_v12, %v1728_v20  ;;  %v491_v33 = vmul.f32 %v484_v12, %v1726_v19 }
  0x28   :  { %236 = vadd.xlane.f32.xlu0 %v235_v44  ;;  %v401_v44 = vmul.f32 %v395_v38, %v1692_v46  ;;  %v1818_v46 = vld [vmem:[%s2454_s3 + $0x4] sm:$0xf]  ;;  %vm1529_vm6 = vcmask 1043459   ;;  %vm1531_vm7 = vcmask 1044484   ;;  %vm1539_vm8 = vcmask 36864  }
  0x29   :  { %v413_v41 = vsel %vm406_vm13, %v398_v40, 0.0  ;;  %v480_v55 = vrot.slane %v1818_v46, %v1658_v18  ;;  %v516_v35 = vsel %vm169_vm0, %v492_v31, 0.0  ;;  %v538_v9 = vrot.slane %v1818_v46, %v1720_v11 }
  0x2a   :  { %v422_v14 = vsel %vm406_vm13, %v401_v44, 0.0  ;;  %v513_v38 = vsel %vm169_vm0, %v491_v33, 0.0 }
  0x2b   :  { %245 = vadd.xlane.f32.xlu1 %v244_v47  ;;  %v1559_v47 = vunpack.c.h.bf16 %v1653_v15  ;;  %v428_v15 = vsel %vm406_vm13, %v403_v48, 0.0  ;;  %v486_v61 = vmul.f32 %v480_v55, %v1677_v36  ;;  %v485_v1 = vmul.f32 %v480_v55, %v1688_v43 }
  0x2c   :  { %242 = vadd.xlane.f32.xlu0 %v241_v50  ;;  %v419_v50 = vsel %vm406_vm13, %v400_v45, 0.0  ;;  %v487_v16 = vmul.f32 %v480_v55, %v1679_v37 }
  0x2d   :  { %v498_v8 = vsel %vm169_vm0, %v486_v61, 0.0  ;;  %v626_v61 = vrot.slane %v1818_v46, %v1759_v49 }
  0x2f   :  { %251 = vadd.xlane.f32.xlu1 %v250_v53  ;;  %v61_v53 = vmul.f32 %v1559_v47, %v1624_v2  ;;  %v546_v47 = vmul.f32 %v538_v9, %v1714_v3 }
  0x30   :  { %248 = vadd.xlane.f32.xlu0 %v247_v56  ;;  %v425_v56 = vsel %vm406_vm13, %v402_v52, 0.0 }
  0x31   :  { %v84_v59 = vadd.f32 %v1629_v5, %v61_v53  ;;  %v562_v52 = vsel %vm228_vm11, %v546_v47, 0.0 }
  0x33   :  { %257 = vadd.xlane.f32.xlu1 %v256_v58  ;;  %v1575_v58 = vunpack.c.h.bf16 %v1700_v51  ;;  %v116_v51 = vmul.f32 0.2, %v84_v59  ;;  %vm100_vm14 = vcmp.ge.f32.partialorder %v84_v59, 0.0 }
  0x34   :  { %254 = vadd.xlane.f32.xlu0 %v253_v60  ;;  %v434_v60 = vsel %vm406_vm13, %v405_v54, 0.0 }
  0x35   :  { %v1846_v21 = vsel %vm100_vm14, %v84_v59, %v116_v51  ;;  %v632_v51 = vmul.f32 %v626_v61, %v1677_v36 }
  0x36   :  { %v489_v28 = vmul.f32 %v480_v55, %v1846_v21  ;;  %v547_v54 = vmul.f32 %v538_v9, %v1846_v21 }
  0x37   :  { %322 = vadd.xlane.f32.xlu1 %v321_v62  ;;  %v431_v62 = vsel %vm406_vm13, %v404_v57, 0.0 }
  0x38   :  { %319 = vadd.xlane.f32.xlu0 %v318_v7  ;;  %v69_v7 = vmul.f32 %v1575_v58, %v1624_v2  ;;  %v565_v57 = vsel %vm228_vm11, %v547_v54, 0.0 }
  0x3b   :  { %328 = vadd.xlane.f32.xlu1 %v327_v10  ;;  %v488_v10 = vmul.f32 %v480_v55, %v1714_v3 }
  0x3c   :  { %325 = vadd.xlane.f32.xlu0 %v324_v13  ;;  %v495_v13 = vsel %vm169_vm0, %v485_v1, 0.0 }
  0x3f   :  { %334 = vadd.xlane.f32.xlu1 %v333_v17  ;;  %v92_v17 = vadd.f32 %v1629_v5, %v69_v7 }
  0x40   :  { %331 = vadd.xlane.f32.xlu0 %v330_v23  ;;  %v504_v23 = vsel %vm169_vm0, %v488_v10, 0.0  ;;  %v631_v10 = vmul.f32 %v626_v61, %v1688_v43 }
  0x41   :  { %v124_v29 = vmul.f32 0.2, %v92_v17  ;;  %vm108_vm15 = vcmp.ge.f32.partialorder %v92_v17, 0.0 }
  0x43   :  { %340 = vadd.xlane.f32.xlu1 %v339_v25  ;;  %v501_v25 = vsel %vm169_vm0, %v487_v16, 0.0  ;;  %v630_v16 = vrot.slane %v1836_v4, %v1759_v49 }
  0x44   :  { %337 = vadd.xlane.f32.xlu0 %v336_v30  ;;  %v510_v30 = vsel %vm169_vm0, %v490_v24, 0.0 }
  0x45   :  { %v638_v31 = vmul.f32 %v630_v16, %v1728_v20  ;;  %v637_v33 = vmul.f32 %v630_v16, %v1726_v19 }
  0x47   :  { %346 = vadd.xlane.f32.xlu1 %v345_v32  ;;  %v507_v32 = vsel %vm169_vm0, %v489_v28, 0.0 }
  0x48   :  { %343 = vadd.xlane.f32.xlu0 %v342_v34  ;;  %v1856_v34 = vsel %vm108_vm15, %v92_v17, %v124_v29  ;;  %v641_v17 = vsel %vm317_vm12, %v631_v10, 0.0  ;;  %v635_v29 = vmul.f32 %v626_v61, %v1846_v21 }
  0x4b   :  { %411 = vadd.xlane.f32.xlu1 %v410_v27  ;;  %v494_v27 = vmul.f32 %v484_v12, %v1856_v34 }
  0x4c   :  { %408 = vadd.xlane.f32.xlu0 %v407_v39  ;;  %v493_v39 = vmul.f32 %v484_v12, %v1736_v26  ;;  %v644_v12 = vsel %vm317_vm12, %v632_v51, 0.0  ;;  %v1953_v51 = vld [vmem:[%s2451_s0 + $0x38] sm:$0xff]  }
  0x4d   :  { %v522_v40 = vsel %vm169_vm0, %v494_v27, 0.0  ;;  %v640_v27 = vmul.f32 %v630_v16, %v1856_v34 }
  0x4e   :  { %v519_v44 = vsel %vm169_vm0, %v493_v39, 0.0  ;;  %v639_v39 = vmul.f32 %v630_v16, %v1736_v26 }
  0x4f   :  { %417 = vadd.xlane.f32.xlu1 %v416_v42  ;;  %v544_v42 = vmul.f32 %v538_v9, %v1677_v36 }
  0x50   :  { %414 = vadd.xlane.f32.xlu0 %v413_v41  ;;  %v543_v41 = vmul.f32 %v538_v9, %v1688_v43 }
  0x51   :  { %v556_v45 = vsel %vm228_vm11, %v544_v42, 0.0 }
  0x52   :  { %v553_v48 = vsel %vm228_vm11, %v543_v41, 0.0 }
  0x53   :  { %423 = vadd.xlane.f32.xlu1 %v422_v14  ;;  %v542_v14 = vrot.slane %v1836_v4, %v1720_v11 }
  0x54   :  { %420 = vadd.xlane.f32.xlu0 %v419_v50  ;;  %v545_v50 = vmul.f32 %v538_v9, %v1679_v37  ;;  %v714_v9 = vrot.slane %v1818_v46, %v1786_v22 }
  0x55   :  { %v548_v53 = vmul.f32 %v542_v14, %v1711_v63  ;;  %v549_v58 = vmul.f32 %v542_v14, %v1726_v19  ;;  %v551_v1 = vmul.f32 %v542_v14, %v1736_v26 }
  0x56   :  { %v720_v42 = vmul.f32 %v714_v9, %v1677_v36  ;;  %v719_v41 = vmul.f32 %v714_v9, %v1688_v43  ;;  %v722_v47 = vmul.f32 %v714_v9, %v1714_v3  ;;  %v1927_v43 = vld [vmem:[%s2451_s0 + $0x18] sm:$0xff]  }
  0x57   :  { %429 = vadd.xlane.f32.xlu1 %v428_v15  ;;  %v559_v15 = vsel %vm228_vm11, %v545_v50, 0.0  ;;  %v568_v55 = vsel %vm228_vm11, %v548_v53, 0.0 }
  0x58   :  { %426 = vadd.xlane.f32.xlu0 %v425_v56  ;;  %v550_v56 = vmul.f32 %v542_v14, %v1728_v20  ;;  %v732_v46 = vsel %vm406_vm13, %v720_v42, 0.0  ;;  %v729_v50 = vsel %vm406_vm13, %v719_v41, 0.0 }
  0x5a   :  { %v574_v59 = vsel %vm228_vm11, %v550_v56, 0.0  ;;  %v723_v56 = vmul.f32 %v714_v9, %v1846_v21 }
  0x5b   :  { %435 = vadd.xlane.f32.xlu1 %v434_v60  ;;  %v552_v60 = vmul.f32 %v542_v14, %v1856_v34  ;;  %v718_v14 = vrot.slane %v1836_v4, %v1786_v22 }
  0x5c   :  { %432 = vadd.xlane.f32.xlu0 %v431_v62  ;;  %v571_v62 = vsel %vm228_vm11, %v549_v58, 0.0 }
  0x5d   :  { %v580_v7 = vsel %vm228_vm11, %v552_v60, 0.0  ;;  %v724_v54 = vmul.f32 %v718_v14, %v1711_v63  ;;  %v726_v60 = vmul.f32 %v718_v14, %v1728_v20 }
  0x5f   :  { %499 = vadd.xlane.f32.xlu1 %v498_v8  ;;  %v577_v8 = vsel %vm228_vm11, %v551_v1, 0.0  ;;  %v1947_v1 = vld [vmem:[%s2454_s3 + $0x8] sm:$0xf]  ;;  %v750_v10 = vsel %vm406_vm13, %v726_v60, 0.0 }
  0x60   :  { %496 = vadd.xlane.f32.xlu0 %v495_v13  ;;  %v634_v13 = vmul.f32 %v626_v61, %v1714_v3 }
  0x62   :  { %v650_v24 = vsel %vm317_vm12, %v634_v13, 0.0  ;;  %v802_v13 = vrot.slane %v1947_v1, %v1658_v18 }
  0x63   :  { %505 = vadd.xlane.f32.xlu1 %v504_v23  ;;  %v633_v23 = vmul.f32 %v626_v61, %v1679_v37 }
  0x64   :  { %502 = vadd.xlane.f32.xlu0 %v501_v25  ;;  %v636_v25 = vmul.f32 %v630_v16, %v1711_v63  ;;  %v725_v63 = vmul.f32 %v718_v14, %v1726_v19 }
  0x65   :  { %v647_v28 = vsel %vm317_vm12, %v633_v23, 0.0  ;;  %v727_v23 = vmul.f32 %v718_v14, %v1736_v26 }
  0x67   :  { %511 = vadd.xlane.f32.xlu1 %v510_v30  ;;  %v656_v30 = vsel %vm317_vm12, %v636_v25, 0.0 }
  0x68   :  { %508 = vadd.xlane.f32.xlu0 %v507_v32  ;;  %v653_v32 = vsel %vm317_vm12, %v635_v29, 0.0 }
  0x6b   :  { %517 = vadd.xlane.f32.xlu1 %v516_v35  ;;  %v662_v35 = vsel %vm317_vm12, %v638_v31, 0.0 }
  0x6c   :  { %514 = vadd.xlane.f32.xlu0 %v513_v38  ;;  %v659_v38 = vsel %vm317_vm12, %v637_v33, 0.0  ;;  %v807_v33 = vmul.f32 %v802_v13, %v1677_v36 }
  0x6f   :  { %523 = vadd.xlane.f32.xlu1 %v522_v40  ;;  %v668_v40 = vsel %vm317_vm12, %v640_v27, 0.0 }
  0x70   :  { %520 = vadd.xlane.f32.xlu0 %v519_v44  ;;  %v665_v44 = vsel %vm317_vm12, %v639_v39, 0.0 }
  0x73   :  { %557 = vadd.xlane.f32.xlu1 %v556_v45 }
  0x74   :  { %554 = vadd.xlane.f32.xlu0 %v553_v48 }
  0x77   :  { %563 = vadd.xlane.f32.xlu1 %v562_v52  ;;  %v721_v52 = vmul.f32 %v714_v9, %v1679_v37 }
  0x78   :  { %560 = vadd.xlane.f32.xlu0 %v559_v15  ;;  %v738_v15 = vsel %vm406_vm13, %v722_v47, 0.0  ;;  %v809_v47 = vmul.f32 %v802_v13, %v1714_v3 }
  0x79   :  { %v735_v4 = vsel %vm406_vm13, %v721_v52, 0.0 }
  0x7a   :  { %v823_v60 = vsel %vm169_vm0, %v809_v47, 0.0 }
  0x7b   :  { %569 = vadd.xlane.f32.xlu1 %v568_v55 }
  0x7c   :  { %566 = vadd.xlane.f32.xlu0 %v565_v57  ;;  %v1562_v57 = vunpack.c.l.bf16 %v1927_v43 }
  0x7f   :  { %575 = vadd.xlane.f32.xlu1 %v574_v59  ;;  %v744_v59 = vsel %vm406_vm13, %v724_v54, 0.0 }
  0x80   :  { %572 = vadd.xlane.f32.xlu0 %v571_v62  ;;  %v741_v62 = vsel %vm406_vm13, %v723_v56, 0.0 }
  0x83   :  { %581 = vadd.xlane.f32.xlu1 %v580_v7  ;;  %v62_v7 = vmul.f32 %v1562_v57, %v1624_v2 }
  0x84   :  { %578 = vadd.xlane.f32.xlu0 %v577_v8 }
  0x85   :  { %v85_v25 = vadd.f32 %v1629_v5, %v62_v7 }
  0x87   :  { %645 = vadd.xlane.f32.xlu1 %v644_v12  ;;  %v728_v12 = vmul.f32 %v718_v14, %v1856_v34  ;;  %v117_v9 = vmul.f32 0.2, %v85_v25  ;;  %vm101_vm1 = vcmp.ge.f32.partialorder %v85_v25, 0.0 }
  0x88   :  { %642 = vadd.xlane.f32.xlu0 %v641_v17  ;;  %v747_v17 = vsel %vm406_vm13, %v725_v63, 0.0 }
  0x89   :  { %v756_v29 = vsel %vm406_vm13, %v728_v12, 0.0 }
  0x8b   :  { %651 = vadd.xlane.f32.xlu1 %v650_v24  ;;  %v1578_v24 = vunpack.c.l.bf16 %v1953_v51 }
  0x8c   :  { %648 = vadd.xlane.f32.xlu0 %v647_v28 }
  0x8d   :  { %v70_v27 = vmul.f32 %v1578_v24, %v1624_v2 }
  0x8f   :  { %657 = vadd.xlane.f32.xlu1 %v656_v30  ;;  %v808_v30 = vmul.f32 %v802_v13, %v1679_v37  ;;  %v93_v2 = vadd.f32 %v1629_v5, %v70_v27  ;;  %v860_v27 = vrot.slane %v1947_v1, %v1720_v11 }
  0x90   :  { %654 = vadd.xlane.f32.xlu0 %v653_v32  ;;  %v753_v32 = vsel %vm406_vm13, %v727_v23, 0.0 }
  0x91   :  { %v820_v39 = vsel %vm169_vm0, %v808_v30, 0.0  ;;  %vm109_vm2 = vcmp.ge.f32.partialorder %v93_v2, 0.0  ;;  %v866_v47 = vmul.f32 %v860_v27, %v1679_v37 }
  0x93   :  { %663 = vadd.xlane.f32.xlu1 %v662_v35  ;;  %v1978_v35 = vld [vmem:[%s2454_s3 + $0x18] sm:$0xf] }
  0x94   :  { %660 = vadd.xlane.f32.xlu0 %v659_v38  ;;  %v806_v42 = vrot.slane %v1978_v35, %v1658_v18 }
  0x96   :  { %v812_v56 = vmul.f32 %v806_v42, %v1726_v19  ;;  %v814_v12 = vmul.f32 %v806_v42, %v1736_v26  ;;  %v813_v24 = vmul.f32 %v806_v42, %v1728_v20 }
  0x97   :  { %669 = vadd.xlane.f32.xlu1 %v668_v40  ;;  %v810_v40 = vmul.f32 %v802_v13, %v1846_v21 }
  0x98   :  { %666 = vadd.xlane.f32.xlu0 %v665_v44  ;;  %v1916_v45 = vpop.xlane.xlu1 %177 }
  0x99   :  { %v172_v48 = vpop.xlane.xlu0 %171 }
  0x9b   :  { %733 = vadd.xlane.f32.xlu1 %v732_v46  ;;  %v817_v46 = vsel %vm169_vm0, %v807_v33, 0.0 }
  0x9c   :  { %730 = vadd.xlane.f32.xlu0 %v729_v50  ;;  %v1929_v53 = vpop.xlane.xlu1 %180  ;;  %v1988_v50 = vsel %vm101_vm1, %v85_v25, %v117_v9 }
  0x9d   :  { %v175_v55 = vpop.xlane.xlu0 %174  ;;  %v811_v5 = vmul.f32 %v802_v13, %v1988_v50 }
  0x9f   :  { %739 = vadd.xlane.f32.xlu1 %v738_v15  ;;  %v829_v13 = vsel %vm169_vm0, %v811_v5, 0.0 }
  0xa0   :  { %736 = vadd.xlane.f32.xlu0 %v735_v4  ;;  %v1936_v58 = vpop.xlane.xlu1 %186  ;;  %v826_v4 = vsel %vm169_vm0, %v810_v40, 0.0  ;;  %v815_v40 = vmul.f32 %v806_v42, %v1856_v34 }
  0xa1   :  { %v1940_v61 = vpop.xlane.xlu0 %183 }
  0xa3   :  { %745 = vadd.xlane.f32.xlu1 %v744_v59 }
  0xa4   :  { %742 = vadd.xlane.f32.xlu0 %v741_v62  ;;  %v1955_v8 = vpop.xlane.xlu1 %192  ;;  %v125_v62 = vmul.f32 0.2, %v93_v2 }
  0xa5   :  { %v1961_v16 = vpop.xlane.xlu0 %189 }
  0xa6   :  { %v2008_v25 = vsel %vm109_vm2, %v93_v2, %v125_v62 }
  0xa7   :  { %751 = vadd.xlane.f32.xlu1 %v750_v10  ;;  %v832_v10 = vsel %vm169_vm0, %v812_v56, 0.0  ;;  %v816_v33 = vmul.f32 %v806_v42, %v2008_v25 }
  0xa8   :  { %748 = vadd.xlane.f32.xlu0 %v747_v17  ;;  %v1967_v28 = vpop.xlane.xlu1 %198 }
  0xa9   :  { %v1971_v31 = vpop.xlane.xlu0 %195 }
  0xab   :  { %757 = vadd.xlane.f32.xlu1 %v756_v29 }
  0xac   :  { %754 = vadd.xlane.f32.xlu0 %v753_v32  ;;  %v234_v38 = vpop.xlane.xlu1 %233  ;;  %v838_v32 = vsel %vm169_vm0, %v814_v12, 0.0 }
  0xad   :  { %v270_v44 = vrot.slane %v234_v38, 1  ;;  %v231_v41 = vpop.xlane.xlu0 %230 }
  0xae   :  { %v269_v14 = vrot.slane %v231_v41, 1 }
  0xaf   :  { %v1990_v52 = vadd.f32 %v270_v44, %v175_v55  ;;  %821 = vadd.xlane.f32.xlu1 %v820_v39  ;;  %v835_v39 = vsel %vm169_vm0, %v813_v24, 0.0 }
  0xb0   :  { %v1992_v15 = vadd.f32 %v269_v14, %v172_v48  ;;  %818 = vadd.xlane.f32.xlu0 %v817_v46  ;;  %v240_v54 = vpop.xlane.xlu1 %239  ;;  %v844_v46 = vsel %vm169_vm0, %v816_v33, 0.0 }
  0xb1   :  { %v272_v57 = vrot.slane %v240_v54, 1  ;;  %v237_v59 = vpop.xlane.xlu0 %236  ;;  %v841_v54 = vsel %vm169_vm0, %v815_v40, 0.0 }
  0xb2   :  { %v271_v63 = vrot.slane %v237_v59, 1  ;;  %v868_v59 = vmul.f32 %v860_v27, %v1846_v21 }
  0xb3   :  { %v1999_v55 = vadd.f32 %v272_v57, %v1929_v53  ;;  %827 = vadd.xlane.f32.xlu1 %v826_v4  ;;  %v865_v4 = vmul.f32 %v860_v27, %v1677_v36  ;;  %v878_v57 = vsel %vm228_vm11, %v866_v47, 0.0 }
  0xb4   :  { %v2002_v48 = vadd.f32 %v271_v63, %v1916_v45  ;;  %824 = vadd.xlane.f32.xlu0 %v823_v60  ;;  %v246_v7 = vpop.xlane.xlu1 %245  ;;  %v864_v60 = vrot.slane %v1978_v35, %v1720_v11 }
  0xb5   :  { %v274_v17 = vrot.slane %v246_v7, 1  ;;  %v243_v23 = vpop.xlane.xlu0 %242  ;;  %v875_v63 = vsel %vm228_vm11, %v865_v4, 0.0  ;;  %v867_v7 = vmul.f32 %v860_v27, %v1714_v3 }
  0xb6   :  { %v273_v53 = vrot.slane %v243_v23, 1  ;;  %v870_v23 = vmul.f32 %v864_v60, %v1726_v19 }
  0xb7   :  { %v294_v29 = vadd.f32 %v274_v17, %v1936_v58  ;;  %833 = vadd.xlane.f32.xlu1 %v832_v10  ;;  %v884_v17 = vsel %vm228_vm11, %v868_v59, 0.0 }
  0xb8   :  { %v293_v45 = vadd.f32 %v273_v53, %v1940_v61  ;;  %830 = vadd.xlane.f32.xlu0 %v829_v13  ;;  %v252_v30 = vpop.xlane.xlu1 %251  ;;  %v881_v53 = vsel %vm228_vm11, %v867_v7, 0.0 }
  0xb9   :  { %v276_v9 = vrot.slane %v252_v30, 1  ;;  %v249_v38 = vpop.xlane.xlu0 %248  ;;  %v869_v30 = vmul.f32 %v860_v27, %v1988_v50  ;;  %v871_v27 = vmul.f32 %v864_v60, %v1728_v20 }
  0xba   :  { %v275_v44 = vrot.slane %v249_v38, 1  ;;  %v872_v38 = vmul.f32 %v864_v60, %v1736_v26 }
  0xbb   :  { %v296_v58 = vadd.f32 %v276_v9, %v1955_v8  ;;  %839 = vadd.xlane.f32.xlu1 %v838_v32  ;;  %v890_v9 = vsel %vm228_vm11, %v870_v23, 0.0 }
  0xbc   :  { %v295_v61 = vadd.f32 %v275_v44, %v1961_v16  ;;  %836 = vadd.xlane.f32.xlu0 %v835_v39  ;;  %v258_v41 = vpop.xlane.xlu1 %257  ;;  %v887_v44 = vsel %vm228_vm11, %v869_v30, 0.0  ;;  %v896_v47 = vsel %vm228_vm11, %v872_v38, 0.0 }
  0xbd   :  { %v278_v2 = vrot.slane %v258_v41, 1  ;;  %v255_v14 = vpop.xlane.xlu0 %254 }
  0xbe   :  { %v277_v56 = vrot.slane %v255_v14, 1  ;;  %v948_v14 = vrot.slane %v1947_v1, %v1759_v49 }
  0xbf   :  { %v298_v42 = vadd.f32 %v278_v2, %v1967_v28  ;;  %845 = vadd.xlane.f32.xlu1 %v844_v46  ;;  %v874_v2 = vmul.f32 %v864_v60, %v2008_v25 }
  0xc0   :  { %v297_v8 = vadd.f32 %v277_v56, %v1971_v31  ;;  %842 = vadd.xlane.f32.xlu0 %v841_v54  ;;  %v323_v16 = vpop.xlane.xlu1 %322  ;;  %v893_v56 = vsel %vm228_vm11, %v871_v27, 0.0 }
  0xc1   :  { %v359_v5 = vrot.slane %v323_v16, 2  ;;  %v320_v62 = vpop.xlane.xlu0 %319  ;;  %v873_v16 = vmul.f32 %v864_v60, %v1856_v34 }
  0xc2   :  { %v358_v10 = vrot.slane %v320_v62, 2  ;;  %v954_v62 = vmul.f32 %v948_v14, %v1679_v37 }
  0xc3   :  { %v2033_v28 = vadd.f32 %v359_v5, %v1990_v52  ;;  %879 = vadd.xlane.f32.xlu1 %v878_v57  ;;  %v902_v5 = vsel %vm228_vm11, %v874_v2, 0.0 }
  0xc4   :  { %v2036_v31 = vadd.f32 %v358_v10, %v1992_v15  ;;  %876 = vadd.xlane.f32.xlu0 %v875_v63  ;;  %v329_v12 = vpop.xlane.xlu1 %328  ;;  %v899_v10 = vsel %vm228_vm11, %v873_v16, 0.0  ;;  %v966_v23 = vsel %vm317_vm12, %v954_v62, 0.0 }
  0xc5   :  { %v361_v13 = vrot.slane %v329_v12, 2  ;;  %v326_v24 = vpop.xlane.xlu0 %325  ;;  %v953_v12 = vmul.f32 %v948_v14, %v1677_v36 }
  0xc6   :  { %v360_v32 = vrot.slane %v326_v24, 2  ;;  %v952_v24 = vrot.slane %v1978_v35, %v1759_v49 }
  0xc7   :  { %v2043_v52 = vadd.f32 %v361_v13, %v1999_v55  ;;  %885 = vadd.xlane.f32.xlu1 %v884_v17  ;;  %v956_v13 = vmul.f32 %v948_v14, %v1846_v21 }
  0xc8   :  { %v2046_v15 = vadd.f32 %v360_v32, %v2002_v48  ;;  %882 = vadd.xlane.f32.xlu0 %v881_v53  ;;  %v335_v33 = vpop.xlane.xlu1 %334  ;;  %v963_v32 = vsel %vm317_vm12, %v953_v12, 0.0 }
  0xc9   :  { %v363_v39 = vrot.slane %v335_v33, 2  ;;  %v332_v40 = vpop.xlane.xlu0 %331  ;;  %v955_v33 = vmul.f32 %v948_v14, %v1714_v3  ;;  %v972_v38 = vsel %vm317_vm12, %v956_v13, 0.0 }
  0xca   :  { %v362_v41 = vrot.slane %v332_v40, 2 }
  0xcb   :  { %v2052_v46 = vadd.f32 %v363_v39, %v294_v29  ;;  %891 = vadd.xlane.f32.xlu1 %v890_v9  ;;  %v958_v39 = vmul.f32 %v952_v24, %v1726_v19 }
  0xcc   :  { %v2054_v55 = vadd.f32 %v362_v41, %v293_v45  ;;  %888 = vadd.xlane.f32.xlu0 %v887_v44  ;;  %v341_v48 = vpop.xlane.xlu1 %340  ;;  %v969_v41 = vsel %vm317_vm12, %v955_v33, 0.0 }
  0xcd   :  { %v365_v54 = vrot.slane %v341_v48, 2  ;;  %v338_v4 = vpop.xlane.xlu0 %337  ;;  %v957_v48 = vmul.f32 %v948_v14, %v1988_v50 }
  0xce   :  { %v364_v29 = vrot.slane %v338_v4, 2  ;;  %v960_v4 = vmul.f32 %v952_v24, %v1736_v26 }
  0xcf   :  { %v2062_v57 = vadd.f32 %v365_v54, %v296_v58  ;;  %897 = vadd.xlane.f32.xlu1 %v896_v47  ;;  %v978_v54 = vsel %vm317_vm12, %v958_v39, 0.0 }
  0xd0   :  { %v2064_v45 = vadd.f32 %v364_v29, %v295_v61  ;;  %894 = vadd.xlane.f32.xlu0 %v893_v56  ;;  %v347_v59 = vpop.xlane.xlu1 %346  ;;  %v975_v29 = vsel %vm317_vm12, %v957_v48, 0.0  ;;  %v984_v62 = vsel %vm317_vm12, %v960_v4, 0.0 }
  0xd1   :  { %v367_v63 = vrot.slane %v347_v59, 2  ;;  %v344_v7 = vpop.xlane.xlu0 %343  ;;  %v959_v59 = vmul.f32 %v952_v24, %v1728_v20 }
  0xd2   :  { %v366_v17 = vrot.slane %v344_v7, 2  ;;  %v1036_v7 = vrot.slane %v1947_v1, %v1786_v22 }
  0xd3   :  { %v2070_v60 = vadd.f32 %v367_v63, %v298_v42  ;;  %903 = vadd.xlane.f32.xlu1 %v902_v5  ;;  %v962_v63 = vmul.f32 %v952_v24, %v2008_v25 }
  0xd4   :  { %v2072_v58 = vadd.f32 %v366_v17, %v297_v8  ;;  %900 = vadd.xlane.f32.xlu0 %v899_v10  ;;  %v412_v61 = vpop.xlane.xlu1 %411  ;;  %v981_v17 = vsel %vm317_vm12, %v959_v59, 0.0  ;;  %v1044_v39 = vmul.f32 %v1036_v7, %v1846_v21 }
  0xd5   :  { %v448_v53 = vrot.slane %v412_v61, 3  ;;  %v409_v30 = vpop.xlane.xlu0 %408  ;;  %v961_v61 = vmul.f32 %v952_v24, %v1856_v34 }
  0xd6   :  { %v447_v42 = vrot.slane %v409_v30, 3  ;;  %v1042_v30 = vmul.f32 %v1036_v7, %v1679_v37 }
  0xd7   :  { %967 = vadd.xlane.f32.xlu1 %v966_v23  ;;  %v468_v8 = vadd.f32 %v448_v53, %v2033_v28  ;;  %v990_v53 = vsel %vm317_vm12, %v962_v63, 0.0  ;;  %v987_v33 = vsel %vm317_vm12, %v961_v61, 0.0 }
  0xd8   :  { %964 = vadd.xlane.f32.xlu0 %v963_v32  ;;  %v418_v9 = vpop.xlane.xlu1 %417  ;;  %v467_v40 = vadd.f32 %v447_v42, %v2036_v31  ;;  %v1041_v42 = vmul.f32 %v1036_v7, %v1677_v36  ;;  %v1043_v36 = vmul.f32 %v1036_v7, %v1714_v3 }
  0xd9   :  { %v450_v44 = vrot.slane %v418_v9, 3  ;;  %v415_v27 = vpop.xlane.xlu0 %414 }
  0xda   :  { %v449_v47 = vrot.slane %v415_v27, 3  ;;  %v1051_v48 = vsel %vm406_vm13, %v1041_v42, 0.0 }
  0xdb   :  { %973 = vadd.xlane.f32.xlu1 %v972_v38  ;;  %v470_v2 = vadd.f32 %v450_v44, %v2043_v52  ;;  %v1054_v38 = vsel %vm406_vm13, %v1042_v30, 0.0  ;;  %v1040_v44 = vrot.slane %v1978_v35, %v1786_v22  ;;  %v1057_v35 = vsel %vm406_vm13, %v1043_v36, 0.0 }
  0xdc   :  { %970 = vadd.xlane.f32.xlu0 %v969_v41  ;;  %v424_v28 = vpop.xlane.xlu1 %423  ;;  %v469_v56 = vadd.f32 %v449_v47, %v2046_v15 }
  0xdd   :  { %v452_v16 = vrot.slane %v424_v28, 3  ;;  %v421_v31 = vpop.xlane.xlu0 %420  ;;  %v1060_v28 = vsel %vm406_vm13, %v1044_v39, 0.0 }
  0xde   :  { %v451_v5 = vrot.slane %v421_v31, 3 }
  0xdf   :  { %979 = vadd.xlane.f32.xlu1 %v978_v54  ;;  %v472_v14 = vadd.f32 %v452_v16, %v2052_v46  ;;  %v1047_v54 = vmul.f32 %v1040_v44, %v1728_v20 }
  0xe0   :  { %976 = vadd.xlane.f32.xlu0 %v975_v29  ;;  %v430_v52 = vpop.xlane.xlu1 %429  ;;  %v471_v15 = vadd.f32 %v451_v5, %v2054_v55  ;;  %v1049_v29 = vmul.f32 %v1040_v44, %v1856_v34 }
  0xe1   :  { %v454_v10 = vrot.slane %v430_v52, 3  ;;  %v427_v12 = vpop.xlane.xlu0 %426 }
  0xe2   :  { %v453_v23 = vrot.slane %v427_v12, 3  ;;  %v1075_v63 = vsel %vm406_vm13, %v1049_v29, 0.0 }
  0xe3   :  { %985 = vadd.xlane.f32.xlu1 %v984_v62  ;;  %v474_v46 = vadd.f32 %v454_v10, %v2062_v57  ;;  %v2129_v62 = vld [vmem:[%s2454_s3 + $0xc] sm:$0xf]  ;;  %v1050_v10 = vmul.f32 %v1040_v44, %v2008_v25 }
  0xe4   :  { %982 = vadd.xlane.f32.xlu0 %v981_v17  ;;  %v436_v13 = vpop.xlane.xlu1 %435  ;;  %v473_v1 = vadd.f32 %v453_v23, %v2064_v45  ;;  %v1045_v23 = vmul.f32 %v1036_v7, %v1988_v50 }
  0xe5   :  { %v456_v32 = vrot.slane %v436_v13, 3  ;;  %v433_v55 = vpop.xlane.xlu0 %432  ;;  %v1078_v30 = vsel %vm406_vm13, %v1050_v10, 0.0 }
  0xe6   :  { %v455_v9 = vrot.slane %v433_v55, 3 }
  0xe7   :  { %991 = vadd.xlane.f32.xlu1 %v990_v53  ;;  %v476_v24 = vadd.f32 %v456_v32, %v2070_v60 }
  0xe8   :  { %988 = vadd.xlane.f32.xlu0 %v987_v33  ;;  %v500_v57 = vpop.xlane.xlu1 %499  ;;  %v475_v45 = vadd.f32 %v455_v9, %v2072_v58  ;;  %v1046_v58 = vmul.f32 %v1040_v44, %v1726_v19  ;;  %v1063_v33 = vsel %vm406_vm13, %v1045_v23, 0.0 }
  0xe9   :  { %v526_v27 = vadd.f32 %v500_v57, %v468_v8  ;;  %v497_v41 = vpop.xlane.xlu0 %496 }
  0xea   :  { %v525_v47 = vadd.f32 %v497_v41, %v467_v40  ;;  %v1069_v40 = vsel %vm406_vm13, %v1047_v54, 0.0  ;;  %v1066_v52 = vsel %vm406_vm13, %v1046_v58, 0.0 }
  0xeb   :  { %1055 = vadd.xlane.f32.xlu1 %v1054_v38 }
  0xec   :  { %1052 = vadd.xlane.f32.xlu0 %v1051_v48  ;;  %v506_v60 = vpop.xlane.xlu1 %505 }
  0xed   :  { %v2116_v4 = vadd.f32 %v506_v60, %v470_v2  ;;  %v503_v16 = vpop.xlane.xlu0 %502  ;;  %v1048_v2 = vmul.f32 %v1040_v44, %v1736_v26 }
  0xee   :  { %v527_v8 = vadd.f32 %v503_v16, %v469_v56 }
  0xef   :  { %1061 = vadd.xlane.f32.xlu1 %v1060_v28  ;;  %v1072_v61 = vsel %vm406_vm13, %v1048_v2, 0.0 }
  0xf0   :  { %1058 = vadd.xlane.f32.xlu0 %v1057_v35  ;;  %v512_v31 = vpop.xlane.xlu1 %511 }
  0xf1   :  { %v2122_v59 = vadd.f32 %v512_v31, %v472_v14  ;;  %v509_v5 = vpop.xlane.xlu0 %508  ;;  %v2135_v14 = vrot.slane %v2129_v62, %v1658_v18 }
  0xf2   :  { %v529_v19 = vadd.f32 %v509_v5, %v471_v15  ;;  %v2144_v15 = vld [vmem:[%s2454_s3 + $0x1c] sm:$0xf] }
  0xf3   :  { %1070 = vadd.xlane.f32.xlu1 %v1069_v40  ;;  %v2151_v32 = vrot.slane %v2144_v15, %v1658_v18  ;;  %v2165_v18 = vrot.slane %v2129_v62, %v1720_v11  ;;  %v2179_v16 = vrot.slane %v2144_v15, %v1720_v11 }
  0xf4   :  { %1067 = vadd.xlane.f32.xlu0 %v1066_v52  ;;  %v518_v56 = vpop.xlane.xlu1 %517 }
  0xf5   :  { %v2137_v12 = vadd.f32 %v518_v56, %v474_v46  ;;  %v515_v17 = vpop.xlane.xlu0 %514  ;;  %v1130_v46 = vmul.f32 %v2135_v14, %v1714_v3  ;;  %v1135_v38 = vmul.f32 %v2151_v32, %v1736_v26  ;;  %v1188_v54 = vmul.f32 %v2165_v18, %v1714_v3 }
  0xf6   :  { %v531_v13 = vadd.f32 %v515_v17, %v473_v1  ;;  %v1129_v1 = vmul.f32 %v2135_v14, %v1679_v37  ;;  %v1193_v11 = vmul.f32 %v2179_v16, %v1736_v26  ;;  %v1192_v10 = vmul.f32 %v2179_v16, %v1728_v20 }
  0xf7   :  { %1076 = vadd.xlane.f32.xlu1 %v1075_v63  ;;  %v1142_v57 = vsel %vm169_vm0, %v1130_v46, 0.0  ;;  %v1157_v28 = vsel %vm169_vm0, %v1135_v38, 0.0  ;;  %v1200_v52 = vsel %vm228_vm11, %v1188_v54, 0.0  ;;  %v1194_v38 = vmul.f32 %v2179_v16, %v1856_v34 }
  0xf8   :  { %1073 = vadd.xlane.f32.xlu0 %v1072_v61  ;;  %v524_v53 = vpop.xlane.xlu1 %523  ;;  %v1139_v44 = vsel %vm169_vm0, %v1129_v1, 0.0  ;;  %v1215_v23 = vsel %vm228_vm11, %v1193_v11, 0.0 }
  0xf9   :  { %v2153_v55 = vadd.f32 %v524_v53, %v476_v24  ;;  %v521_v7 = vpop.xlane.xlu0 %520  ;;  %v1136_v53 = vmul.f32 %v2151_v32, %v1856_v34 }
  0xfa   :  { %v2158_v42 = vadd.f32 %v521_v7, %v475_v45  ;;  %v1134_v45 = vmul.f32 %v2151_v32, %v1728_v20  ;;  %v1212_v7 = vsel %vm228_vm11, %v1192_v10, 0.0  ;;  %v2243_v10 = vrot.slane %v2129_v62, %v1759_v49 }
  0xfb   :  { %1079 = vadd.xlane.f32.xlu1 %v1078_v30 }
  0xfc   :  { %1064 = vadd.xlane.f32.xlu0 %v1063_v33  ;;  %v558_v9 = vpop.xlane.xlu1 %557  ;;  %v1154_v31 = vsel %vm169_vm0, %v1134_v45, 0.0  ;;  %v1131_v33 = vmul.f32 %v2135_v14, %v1846_v21  ;;  %v1189_v45 = vmul.f32 %v2165_v18, %v1846_v21 }
  0xfd   :  { %v594_v24 = vrot.slane %v558_v9, 1  ;;  %v555_v39 = vpop.xlane.xlu0 %554 }
  0xfe   :  { %v593_v41 = vrot.slane %v555_v39, 1 }
  0xff   :  { %v2170_v48 = vadd.f32 %v594_v24, %v526_v27  ;;  %1143 = vadd.xlane.f32.xlu1 %v1142_v57  ;;  %v1187_v27 = vmul.f32 %v2165_v18, %v1679_v37  ;;  %v1160_v57 = vsel %vm169_vm0, %v1136_v53, 0.0 }
 0x100   :  { %v2172_v36 = vadd.f32 %v593_v41, %v525_v47  ;;  %1140 = vadd.xlane.f32.xlu0 %v1139_v44  ;;  %v564_v60 = vpop.xlane.xlu1 %563  ;;  %v1145_v44 = vsel %vm169_vm0, %v1131_v33, 0.0  ;;  %v2258_v33 = vrot.slane %v2144_v15, %v1759_v49 }
 0x101   :  { %v596_v35 = vrot.slane %v564_v60, 1  ;;  %v561_v58 = vpop.xlane.xlu0 %560  ;;  %v1197_v63 = vsel %vm228_vm11, %v1187_v27, 0.0 }
 0x102   :  { %v595_v47 = vrot.slane %v561_v58, 1  ;;  %v1137_v58 = vmul.f32 %v2151_v32, %v2008_v25  ;;  %v1281_v49 = vmul.f32 %v2258_v33, %v1736_v26 }
 0x103   :  { %v2185_v40 = vadd.f32 %v596_v35, %v2116_v4  ;;  %1158 = vadd.xlane.f32.xlu1 %v1157_v28  ;;  %v1218_v35 = vsel %vm228_vm11, %v1194_v38, 0.0 }
 0x104   :  { %v2187_v29 = vadd.f32 %v595_v47, %v527_v8  ;;  %1155 = vadd.xlane.f32.xlu0 %v1154_v31  ;;  %v570_v5 = vpop.xlane.xlu1 %569 }
 0x105   :  { %v598_v2 = vrot.slane %v570_v5, 1  ;;  %v567_v56 = vpop.xlane.xlu0 %566 }
 0x106   :  { %v597_v17 = vrot.slane %v567_v56, 1  ;;  %v1163_v56 = vsel %vm169_vm0, %v1137_v58, 0.0 }
 0x107   :  { %v2196_v4 = vadd.f32 %v598_v2, %v2122_v59  ;;  %1201 = vadd.xlane.f32.xlu1 %v1200_v52 }
 0x108   :  { %v2198_v8 = vadd.f32 %v597_v17, %v529_v19  ;;  %1198 = vadd.xlane.f32.xlu0 %v1197_v63  ;;  %v576_v61 = vpop.xlane.xlu1 %575  ;;  %v1195_v63 = vmul.f32 %v2179_v16, %v2008_v25 }
 0x109   :  { %v600_v30 = vrot.slane %v576_v61, 1  ;;  %v573_v46 = vpop.xlane.xlu0 %572 }
 0x10a   :  { %v599_v1 = vrot.slane %v573_v46, 1  ;;  %v1221_v46 = vsel %vm228_vm11, %v1195_v63, 0.0 }
 0x10b   :  { %v2207_v59 = vadd.f32 %v600_v30, %v2137_v12  ;;  %1216 = vadd.xlane.f32.xlu1 %v1215_v23  ;;  %v1579_v12 = vunpack.c.h.bf16 %v1953_v51  ;;  %v1203_v51 = vsel %vm228_vm11, %v1189_v45, 0.0 }
 0x10c   :  { %v2209_v19 = vadd.f32 %v599_v1, %v531_v13  ;;  %1213 = vadd.xlane.f32.xlu0 %v1212_v7  ;;  %v582_v9 = vpop.xlane.xlu1 %581  ;;  %v1563_v13 = vunpack.c.h.bf16 %v1927_v43  ;;  %v1132_v43 = vmul.f32 %v2135_v14, %v1988_v50  ;;  %v1276_v7 = vmul.f32 %v2243_v10, %v1714_v3 }
 0x10d   :  { %v602_v24 = vrot.slane %v582_v9, 1  ;;  %v579_v39 = vpop.xlane.xlu0 %578 }
 0x10e   :  { %v601_v41 = vrot.slane %v579_v39, 1  ;;  %v1148_v61 = vsel %vm169_vm0, %v1132_v43, 0.0 }
 0x10f   :  { %v2220_v60 = vadd.f32 %v602_v24, %v2153_v55  ;;  %1161 = vadd.xlane.f32.xlu1 %v1160_v57  ;;  %v1590_v55 = vld [vmem:[%s2452_s1] ss:$0 sm:$0xff]  ;;  %v1275_v57 = vmul.f32 %v2243_v10, %v1679_v37 }
 0x110   :  { %v621_v28 = vadd.f32 %v601_v41, %v2158_v42  ;;  %1146 = vadd.xlane.f32.xlu0 %v1145_v44  ;;  %v646_v54 = vpop.xlane.xlu1 %645  ;;  %v71_v47 = vmul.f32 %v1590_v55, %v1579_v12  ;;  %v63_v5 = vmul.f32 %v1590_v55, %v1563_v13  ;;  %v1288_v44 = vsel %vm317_vm12, %v1276_v7, 0.0 }
 0x111   :  { %v682_v31 = vrot.slane %v646_v54, 2  ;;  %v643_v27 = vpop.xlane.xlu0 %642  ;;  %v1285_v12 = vsel %vm317_vm12, %v1275_v57, 0.0  ;;  %v1280_v41 = vmul.f32 %v2258_v33, %v1728_v20 }
 0x112   :  { %v681_v42 = vrot.slane %v643_v27, 2  ;;  %v1303_v27 = vsel %vm317_vm12, %v1281_v49, 0.0 }
 0x113   :  { %v2233_v52 = vadd.f32 %v682_v31, %v2170_v48  ;;  %1219 = vadd.xlane.f32.xlu1 %v1218_v35  ;;  %v1190_v48 = vmul.f32 %v2165_v18, %v1988_v50  ;;  %v1300_v55 = vsel %vm317_vm12, %v1280_v41, 0.0 }
 0x114   :  { %v701_v11 = vadd.f32 %v681_v42, %v2172_v36  ;;  %1204 = vadd.xlane.f32.xlu0 %v1203_v51  ;;  %v2236_v2 = vpop.xlane.xlu1 %651  ;;  %v1591_v36 = vld [vmem:[%s2453_s2] ss:$0 sm:$0xff] }
 0x115   :  { %v649_v17 = vpop.xlane.xlu0 %648  ;;  %v94_v23 = vadd.f32 %v1591_v36, %v71_v47  ;;  %v86_v53 = vadd.f32 %v1591_v36, %v63_v5  ;;  %v1206_v9 = vsel %vm228_vm11, %v1190_v48, 0.0 }
 0x116   :  { %v683_v36 = vrot.slane %v649_v17, 2 }
 0x117   :  { %1164 = vadd.xlane.f32.xlu1 %v1163_v56  ;;  %v126_v38 = vmul.f32 0.2, %v94_v23  ;;  %vm110_vm3 = vcmp.ge.f32.partialorder %v94_v23, 0.0  ;;  %v118_v24 = vmul.f32 0.2, %v86_v53  ;;  %vm102_vm4 = vcmp.ge.f32.partialorder %v86_v53, 0.0 }
 0x118   :  { %1149 = vadd.xlane.f32.xlu0 %v1148_v61  ;;  %v2251_v30 = vpop.xlane.xlu1 %657 }
 0x119   :  { %v655_v1 = vpop.xlane.xlu0 %654  ;;  %v2271_v13 = vsel %vm110_vm3, %v94_v23, %v126_v38  ;;  %v2273_v35 = vsel %vm102_vm4, %v86_v53, %v118_v24  ;;  %v1282_v53 = vmul.f32 %v2258_v33, %v1856_v34  ;;  %v1283_v38 = vmul.f32 %v2258_v33, %v2008_v25 }
 0x11a   :  { %v1138_v51 = vmul.f32 %v2151_v32, %v2271_v13  ;;  %v1133_v47 = vmul.f32 %v2135_v14, %v2273_v35  ;;  %v1196_v63 = vmul.f32 %v2179_v16, %v2271_v13  ;;  %v1191_v48 = vmul.f32 %v2165_v18, %v2273_v35 }
 0x11b   :  { %1222 = vadd.xlane.f32.xlu1 %v1221_v46  ;;  %v703_v18 = vadd.f32 %v683_v36, %v2187_v29  ;;  %v685_v17 = vrot.slane %v655_v1, 2  ;;  %v1278_v29 = vmul.f32 %v2243_v10, %v1988_v50 }
 0x11c   :  { %1207 = vadd.xlane.f32.xlu0 %v1206_v9  ;;  %v2263_v39 = vpop.xlane.xlu1 %663  ;;  %v1166_v56 = vsel %vm169_vm0, %v1138_v51, 0.0  ;;  %v1151_v32 = vsel %vm169_vm0, %v1133_v47, 0.0  ;;  %v1209_v16 = vsel %vm228_vm11, %v1191_v48, 0.0  ;;  %v1277_v9 = vmul.f32 %v2243_v10, %v1846_v21 }
 0x11d   :  { %v661_v45 = vpop.xlane.xlu0 %660  ;;  %v705_v1 = vadd.f32 %v685_v17, %v2198_v8  ;;  %vm1525_vm0 = vcmask 1041409  }
 0x11e   :  { %v687_v54 = vrot.slane %v661_v45, 2 }
 0x11f   :  { %1289 = vadd.xlane.f32.xlu1 %v1288_v44  ;;  %v1306_v44 = vsel %vm317_vm12, %v1282_v53, 0.0 }
 0x120   :  { %v2276_v58 = vadd.f32 %v687_v54, %v2209_v19  ;;  %1286 = vadd.xlane.f32.xlu0 %v1285_v12  ;;  %v2278_v31 = vpop.xlane.xlu1 %669  ;;  %v1291_v12 = vsel %vm317_vm12, %v1277_v9, 0.0  ;;  %v1309_v54 = vsel %vm317_vm12, %v1283_v38, 0.0 }
 0x121   :  { %v667_v43 = vpop.xlane.xlu0 %666  ;;  %v690_v8 = vrot.slane %v2278_v31, 2 }
 0x122   :  { %v689_v42 = vrot.slane %v667_v43, 2  ;;  %v2325_v43 = vrot.slane %v2144_v15, %v1786_v22  ;;  %v684_v15 = vrot.slane %v2236_v2, 2  ;;  %v1284_v2 = vmul.f32 %v2258_v33, %v2271_v13 }
 0x123   :  { %1304 = vadd.xlane.f32.xlu1 %v1303_v27  ;;  %v710_v31 = vadd.f32 %v690_v8, %v2220_v60  ;;  %v1279_v60 = vmul.f32 %v2243_v10, %v2273_v35 }
 0x124   :  { %v2286_v5 = vadd.f32 %v689_v42, %v621_v28  ;;  %1301 = vadd.xlane.f32.xlu0 %v1300_v55  ;;  %v734_v19 = vpop.xlane.xlu1 %733  ;;  %v1224_v28 = vsel %vm228_vm11, %v1196_v63, 0.0  ;;  %v1294_v42 = vsel %vm317_vm12, %v1278_v29, 0.0 }
 0x125   :  { %v731_v61 = vpop.xlane.xlu0 %730  ;;  %v770_v63 = vrot.slane %v734_v19, 3  ;;  %v1368_v19 = vmul.f32 %v2325_v43, %v1728_v20  ;;  %v704_v20 = vadd.f32 %v684_v15, %v2185_v40  ;;  %v1297_v10 = vsel %vm317_vm12, %v1279_v60, 0.0 }
 0x126   :  { %v769_v23 = vrot.slane %v731_v61, 3  ;;  %v1370_v40 = vmul.f32 %v2325_v43, %v1856_v34  ;;  %v1371_v34 = vmul.f32 %v2325_v43, %v2008_v25 }
 0x127   :  { %1167 = vadd.xlane.f32.xlu1 %v1166_v56  ;;  %v790_v53 = vadd.f32 %v770_v63, %v2233_v52  ;;  %v1388_v52 = vsel %vm406_vm13, %v1368_v19, 0.0 }
 0x128   :  { %1152 = vadd.xlane.f32.xlu0 %v1151_v32  ;;  %v2294_v14 = vpop.xlane.xlu1 %739  ;;  %v789_v46 = vadd.f32 %v769_v23, %v701_v11  ;;  %v2310_v11 = vrot.slane %v2129_v62, %v1786_v22 }
 0x129   :  { %v737_v7 = vpop.xlane.xlu0 %736 }
 0x12a   :  { %v771_v57 = vrot.slane %v737_v7, 3  ;;  %v1364_v62 = vmul.f32 %v2310_v11, %v1714_v3  ;;  %v1363_v51 = vmul.f32 %v2310_v11, %v1679_v37  ;;  %v1369_v37 = vmul.f32 %v2325_v43, %v1736_v26 }
 0x12b   :  { %1225 = vadd.xlane.f32.xlu1 %v1224_v28  ;;  %v772_v28 = vrot.slane %v2294_v14, 3  ;;  %v686_v14 = vrot.slane %v2251_v30, 2  ;;  %v1367_v63 = vmul.f32 %v2310_v11, %v2273_v35 }
 0x12c   :  { %1210 = vadd.xlane.f32.xlu0 %v1209_v16  ;;  %v2305_v24 = vpop.xlane.xlu1 %745  ;;  %v791_v49 = vadd.f32 %v771_v57, %v703_v18  ;;  %v1376_v3 = vsel %vm406_vm13, %v1364_v62, 0.0  ;;  %v1373_v32 = vsel %vm406_vm13, %v1363_v51, 0.0 }
 0x12d   :  { %v743_v45 = vpop.xlane.xlu0 %742  ;;  %v774_v57 = vrot.slane %v2305_v24, 3  ;;  %v792_v38 = vadd.f32 %v772_v28, %v704_v20  ;;  %v706_v30 = vadd.f32 %v686_v14, %v2196_v4 }
 0x12e   :  { %v773_v41 = vrot.slane %v743_v45, 3 }
 0x12f   :  { %1307 = vadd.xlane.f32.xlu1 %v1306_v44  ;;  %v1312_v44 = vsel %vm317_vm12, %v1284_v2, 0.0 }
 0x130   :  { %1292 = vadd.xlane.f32.xlu0 %v1291_v12  ;;  %v2317_v27 = vpop.xlane.xlu1 %751  ;;  %v793_v55 = vadd.f32 %v773_v41, %v705_v1  ;;  %v794_v1 = vadd.f32 %v774_v57, %v706_v30 }
 0x131   :  { %v749_v47 = vpop.xlane.xlu0 %748  ;;  %v776_v29 = vrot.slane %v2317_v27, 3 }
 0x132   :  { %v775_v56 = vrot.slane %v749_v47, 3  ;;  %v1397_v47 = vsel %vm406_vm13, %v1371_v34, 0.0 }
 0x133   :  { %1310 = vadd.xlane.f32.xlu1 %v1309_v54  ;;  %v1394_v54 = vsel %vm406_vm13, %v1370_v40, 0.0 }
 0x134   :  { %1295 = vadd.xlane.f32.xlu0 %v1294_v42  ;;  %v758_v61 = vpop.xlane.xlu1 %757  ;;  %v2334_v22 = vadd.f32 %v775_v56, %v2276_v58  ;;  %v1391_v58 = vsel %vm406_vm13, %v1369_v37, 0.0  ;;  %v1372_v42 = vmul.f32 %v2325_v43, %v2271_v13  ;;  %v1385_v13 = vsel %vm406_vm13, %v1367_v63, 0.0 }
 0x135   :  { %v778_v48 = vrot.slane %v758_v61, 3  ;;  %v755_v36 = vpop.xlane.xlu0 %754  ;;  %v1592_v61 = vmov 0  }
 0x136   :  { %v777_v23 = vrot.slane %v755_v36, 3  ;;  %1589 = vset.pattern.permute.xlu1 %v1592_v61  ;;  %1588 = vset.pattern.permute.xlu0 %v1592_v61 }
 0x137   :  { %1377 = vadd.xlane.f32.xlu1 %v1376_v3  ;;  %v798_v7 = vadd.f32 %v778_v48, %v710_v31  ;;  %v1400_v3 = vsel %vm406_vm13, %v1372_v42, 0.0 }
 0x138   :  { %1374 = vadd.xlane.f32.xlu0 %v1373_v32  ;;  %v822_v26 = vpop.xlane.xlu1 %821  ;;  %v797_v16 = vadd.f32 %v777_v23, %v2286_v5  ;;  %v688_v5 = vrot.slane %v2263_v39, 2 }
 0x139   :  { %v848_v9 = vadd.f32 %v822_v26, %v790_v53  ;;  %v819_v18 = vpop.xlane.xlu0 %818 }
 0x13a   :  { %v847_v17 = vadd.f32 %v819_v18, %v789_v46  ;;  %v1365_v46 = vmul.f32 %v2310_v11, %v1846_v21  ;;  %v708_v4 = vadd.f32 %v688_v5, %v2207_v59  ;;  %v1366_v21 = vmul.f32 %v2310_v11, %v1988_v50 }
 0x13b   :  { %1392 = vadd.xlane.f32.xlu1 %v1391_v58 }
 0x13c   :  { %1389 = vadd.xlane.f32.xlu0 %v1388_v52  ;;  %v828_v33 = vpop.xlane.xlu1 %827  ;;  %v1379_v51 = vsel %vm406_vm13, %v1365_v46, 0.0  ;;  %v796_v27 = vadd.f32 %v776_v29, %v708_v4  ;;  %v1382_v59 = vsel %vm406_vm13, %v1366_v21, 0.0 }
 0x13d   :  { %v850_v45 = vadd.f32 %v828_v33, %v792_v38  ;;  %v825_v12 = vpop.xlane.xlu0 %824 }
 0x13e   :  { %v849_v24 = vadd.f32 %v825_v12, %v791_v49 }
 0x13f   :  { %1313 = vadd.xlane.f32.xlu1 %v1312_v44 }
 0x140   :  { %1298 = vadd.xlane.f32.xlu0 %v1297_v10  ;;  %v834_v41 = vpop.xlane.xlu1 %833 }
 0x141   :  { %v852_v39 = vadd.f32 %v834_v41, %v794_v1  ;;  %v831_v62 = vpop.xlane.xlu0 %830 }
 0x142   :  { %v851_v49 = vadd.f32 %v831_v62, %v793_v55 }
 0x143   :  { %1395 = vadd.xlane.f32.xlu1 %v1394_v54 }
 0x144   :  { %1380 = vadd.xlane.f32.xlu0 %v1379_v51  ;;  %v840_v8 = vpop.xlane.xlu1 %839 }
 0x145   :  { %v854_v25 = vadd.f32 %v840_v8, %v796_v27  ;;  %v837_v56 = vpop.xlane.xlu0 %836 }
 0x146   :  { %v853_v50 = vadd.f32 %v837_v56, %v2334_v22 }
 0x147   :  { %1398 = vadd.xlane.f32.xlu1 %v1397_v47 }
 0x148   :  { %1383 = vadd.xlane.f32.xlu0 %v1382_v59  ;;  %v846_v55 = vpop.xlane.xlu1 %845 }
 0x149   :  { %v856_v32 = vadd.f32 %v846_v55, %v798_v7  ;;  %v843_v37 = vpop.xlane.xlu0 %842 }
 0x14a   :  { %v855_v43 = vadd.f32 %v843_v37, %v797_v16 }
 0x14b   :  { %1401 = vadd.xlane.f32.xlu1 %v1400_v3 }
 0x14c   :  { %1386 = vadd.xlane.f32.xlu0 %v1385_v13  ;;  %v880_v15 = vpop.xlane.xlu1 %879 }
 0x14d   :  { %v916_v31 = vrot.slane %v880_v15, 1  ;;  %v877_v35 = vpop.xlane.xlu0 %876 }
 0x14e   :  { %v915_v11 = vrot.slane %v877_v35, 1 }
 0x14f   :  { %v936_v48 = vadd.f32 %v916_v31, %v848_v9 }
 0x150   :  { %v935_v36 = vadd.f32 %v915_v11, %v847_v17  ;;  %v886_v19 = vpop.xlane.xlu1 %885 }
 0x151   :  { %v918_v22 = vrot.slane %v886_v19, 1  ;;  %v883_v23 = vpop.xlane.xlu0 %882 }
 0x152   :  { %v917_v28 = vrot.slane %v883_v23, 1 }
 0x153   :  { %v938_v53 = vadd.f32 %v918_v22, %v850_v45 }
 0x154   :  { %v937_v26 = vadd.f32 %v917_v28, %v849_v24  ;;  %v892_v58 = vpop.xlane.xlu1 %891 }
 0x155   :  { %v920_v7 = vrot.slane %v892_v58, 1  ;;  %v889_v2 = vpop.xlane.xlu0 %888 }
 0x156   :  { %v919_v60 = vrot.slane %v889_v2, 1 }
 0x157   :  { %v940_v20 = vadd.f32 %v920_v7, %v852_v39 }
 0x158   :  { %v939_v16 = vadd.f32 %v919_v60, %v851_v49  ;;  %v898_v14 = vpop.xlane.xlu1 %897 }
 0x159   :  { %v922_v18 = vrot.slane %v898_v14, 1  ;;  %v895_v52 = vpop.xlane.xlu0 %894 }
 0x15a   :  { %v921_v57 = vrot.slane %v895_v52, 1 }
 0x15b   :  { %v942_v38 = vadd.f32 %v922_v18, %v854_v25 }
 0x15c   :  { %v941_v33 = vadd.f32 %v921_v57, %v853_v50  ;;  %v904_v9 = vpop.xlane.xlu1 %903 }
 0x15d   :  { %v924_v17 = vrot.slane %v904_v9, 1  ;;  %v901_v44 = vpop.xlane.xlu0 %900 }
 0x15e   :  { %v923_v10 = vrot.slane %v901_v44, 1 }
 0x15f   :  { %v944_v40 = vadd.f32 %v924_v17, %v856_v32 }
 0x160   :  { %v943_v30 = vadd.f32 %v923_v10, %v855_v43  ;;  %v968_v5 = vpop.xlane.xlu1 %967 }
 0x161   :  { %v1004_v45 = vrot.slane %v968_v5, 2  ;;  %v965_v12 = vpop.xlane.xlu0 %964 }
 0x162   :  { %v1003_v46 = vrot.slane %v965_v12, 2 }
 0x163   :  { %v1024_v24 = vadd.f32 %v1004_v45, %v936_v48 }
 0x164   :  { %v1023_v29 = vadd.f32 %v1003_v46, %v935_v36  ;;  %v974_v1 = vpop.xlane.xlu1 %973 }
 0x165   :  { %v1006_v41 = vrot.slane %v974_v1, 2  ;;  %v971_v54 = vpop.xlane.xlu0 %970 }
 0x166   :  { %v1005_v34 = vrot.slane %v971_v54, 2 }
 0x167   :  { %v1026_v4 = vadd.f32 %v1006_v41, %v938_v53 }
 0x168   :  { %v1025_v39 = vadd.f32 %v1005_v34, %v937_v26  ;;  %v980_v62 = vpop.xlane.xlu1 %979 }
 0x169   :  { %v1008_v51 = vrot.slane %v980_v62, 2  ;;  %v977_v21 = vpop.xlane.xlu0 %976 }
 0x16a   :  { %v1007_v49 = vrot.slane %v977_v21, 2 }
 0x16b   :  { %v1028_v27 = vadd.f32 %v1008_v51, %v940_v20 }
 0x16c   :  { %v1027_v8 = vadd.f32 %v1007_v49, %v939_v16  ;;  %v986_v47 = vpop.xlane.xlu1 %985 }
 0x16d   :  { %v1010_v42 = vrot.slane %v986_v47, 2  ;;  %v983_v25 = vpop.xlane.xlu0 %982 }
 0x16e   :  { %v1009_v56 = vrot.slane %v983_v25, 2 }
 0x16f   :  { %v1030_v59 = vadd.f32 %v1010_v42, %v942_v38 }
 0x170   :  { %v1029_v63 = vadd.f32 %v1009_v56, %v941_v33  ;;  %v992_v61 = vpop.xlane.xlu1 %991 }
 0x171   :  { %v1012_v50 = vrot.slane %v992_v61, 2  ;;  %v989_v55 = vpop.xlane.xlu0 %988 }
 0x172   :  { %v1011_v3 = vrot.slane %v989_v55, 2 }
 0x173   :  { %v1032_v32 = vadd.f32 %v1012_v50, %v944_v40 }
 0x174   :  { %v1031_v37 = vadd.f32 %v1011_v3, %v943_v30  ;;  %v1056_v13 = vpop.xlane.xlu1 %1055 }
 0x175   :  { %v1092_v43 = vrot.slane %v1056_v13, 3  ;;  %v1053_v15 = vpop.xlane.xlu0 %1052 }
 0x176   :  { %v1091_v31 = vrot.slane %v1053_v15, 3 }
 0x177   :  { %v1112_v35 = vadd.f32 %v1092_v43, %v1024_v24 }
 0x178   :  { %v1062_v11 = vpop.xlane.xlu1 %1061  ;;  %v1111_v48 = vadd.f32 %v1091_v31, %v1023_v29 }
 0x179   :  { %v1094_v36 = vrot.slane %v1062_v11, 3  ;;  %v1059_v19 = vpop.xlane.xlu0 %1058 }
 0x17a   :  { %v1093_v22 = vrot.slane %v1059_v19, 3 }
 0x17b   :  { %v2377_v23 = vadd.f32 %v1094_v36, %v1026_v4 }
 0x17c   :  { %v1071_v28 = vpop.xlane.xlu1 %1070  ;;  %v2379_v53 = vadd.f32 %v1093_v22, %v1025_v39 }
 0x17d   :  { %v1097_v26 = vrot.slane %v1071_v28, 3  ;;  %v1068_v58 = vpop.xlane.xlu0 %1067 }
 0x17e   :  { %v1096_v7 = vrot.slane %v1068_v58, 3 }
 0x17f   :  { %v2381_v2 = vadd.f32 %v1097_v26, %v1029_v63 }
 0x180   :  { %v1077_v60 = vpop.xlane.xlu1 %1076  ;;  %v1116_v20 = vadd.f32 %v1096_v7, %v1028_v27 }
 0x181   :  { %v1099_v16 = vrot.slane %v1077_v60, 3  ;;  %v1074_v14 = vpop.xlane.xlu0 %1073 }
 0x182   :  { %v1098_v18 = vrot.slane %v1074_v14, 3 }
 0x183   :  { %v2383_v52 = vadd.f32 %v1099_v16, %v1031_v37 }
 0x184   :  { %v1080_v57 = vpop.xlane.xlu1 %1079  ;;  %v2385_v38 = vadd.f32 %v1098_v18, %v1030_v59 }
 0x185   :  { %v1100_v33 = vrot.slane %v1080_v57, 3  ;;  %v1065_v9 = vpop.xlane.xlu0 %1064 }
 0x186   :  { %v1095_v17 = vrot.slane %v1065_v9, 3 }
 0x187   :  { %v2387_v44 = vadd.f32 %v1100_v33, %v1032_v32 }
 0x188   :  { %v1144_v10 = vpop.xlane.xlu1 %1143  ;;  %v2389_v40 = vadd.f32 %v1095_v17, %v1027_v8 }
 0x189   :  { %v1141_v30 = vpop.xlane.xlu0 %1140  ;;  %v1170_v3 = vadd.f32 %v1144_v10, %v1112_v35 }
 0x18a   :  { %v1169_v13 = vadd.f32 %v1141_v30, %v1111_v48 }
 0x18c   :  { %v1159_v5 = vpop.xlane.xlu1 %1158 }
 0x18d   :  { %v1156_v45 = vpop.xlane.xlu0 %1155  ;;  %v1175_v48 = vadd.f32 %v1159_v5, %v2381_v2 }
 0x18e   :  { %v1174_v26 = vadd.f32 %v1156_v45, %v1116_v20 }
 0x190   :  { %v1202_v12 = vpop.xlane.xlu1 %1201 }
 0x191   :  { %v1199_v46 = vpop.xlane.xlu0 %1198  ;;  %v1238_v61 = vrot.slane %v1202_v12, 1 }
 0x192   :  { %v1237_v50 = vrot.slane %v1199_v46, 1 }
 0x193   :  { %v1258_v15 = vadd.f32 %v1238_v61, %v1170_v3 }
 0x194   :  { %v1217_v24 = vpop.xlane.xlu1 %1216  ;;  %v1257_v31 = vadd.f32 %v1237_v50, %v1169_v13 }
 0x195   :  { %v1214_v29 = vpop.xlane.xlu0 %1213  ;;  %v1243_v14 = vrot.slane %v1217_v24, 1 }
 0x196   :  { %v1242_v11 = vrot.slane %v1214_v29, 1 }
 0x197   :  { %v1263_v30 = vadd.f32 %v1243_v14, %v1175_v48 }
 0x198   :  { %v2391_v1 = vpop.xlane.xlu1 %1161  ;;  %v1262_v18 = vadd.f32 %v1242_v11, %v1174_v26 }
 0x199   :  { %v1147_v41 = vpop.xlane.xlu0 %1146 }
 0x19c   :  { %v2393_v54 = vpop.xlane.xlu1 %1219 }
 0x19d   :  { %v1205_v34 = vpop.xlane.xlu0 %1204 }
 0x19e   :  { %v1239_v12 = vrot.slane %v1205_v34, 1 }
 0x1a0   :  { %v2395_v4 = vpop.xlane.xlu1 %1164 }
 0x1a1   :  { %v2397_v39 = vpop.xlane.xlu0 %1149 }
 0x1a4   :  { %v2399_v62 = vpop.xlane.xlu1 %1222 }
 0x1a5   :  { %v2401_v51 = vpop.xlane.xlu0 %1207 }
 0x1a8   :  { %v1290_v21 = vpop.xlane.xlu1 %1289 }
 0x1a9   :  { %v1287_v49 = vpop.xlane.xlu0 %1286  ;;  %v1326_v32 = vrot.slane %v1290_v21, 2  ;;  %v1171_v21 = vadd.f32 %v1147_v41, %v2379_v53  ;;  %v1240_v41 = vrot.slane %v2401_v51, 1 }
 0x1aa   :  { %v1325_v43 = vrot.slane %v1287_v49, 2 }
 0x1ab   :  { %v1346_v19 = vadd.f32 %v1326_v32, %v1258_v15  ;;  %v1259_v61 = vadd.f32 %v1239_v12, %v1171_v21 }
 0x1ac   :  { %v1305_v27 = vpop.xlane.xlu1 %1304  ;;  %v1345_v58 = vadd.f32 %v1325_v43, %v1257_v31 }
 0x1ad   :  { %v1302_v8 = vpop.xlane.xlu0 %1301  ;;  %v1331_v9 = vrot.slane %v1305_v27, 2  ;;  %v1176_v27 = vadd.f32 %v2391_v1, %v2385_v38  ;;  %v1172_v38 = vadd.f32 %v2397_v39, %v2377_v23 }
 0x1ae   :  { %v1330_v7 = vrot.slane %v1302_v8, 2  ;;  %v1244_v8 = vrot.slane %v2393_v54, 1 }
 0x1af   :  { %v1351_v24 = vadd.f32 %v1331_v9, %v1263_v30 }
 0x1b0   :  { %v2403_v47 = vpop.xlane.xlu1 %1167  ;;  %v1350_v17 = vadd.f32 %v1330_v7, %v1262_v18  ;;  %v1264_v53 = vadd.f32 %v1244_v8, %v1176_v27 }
 0x1b1   :  { %v2405_v42 = vpop.xlane.xlu0 %1152  ;;  %v1178_v15 = vadd.f32 %v2403_v47, %v2387_v44  ;;  %v1177_v44 = vadd.f32 %v2395_v4, %v2383_v52 }
 0x1b2   :  { %v1173_v14 = vadd.f32 %v2405_v42, %v2389_v40 }
 0x1b4   :  { %v2407_v25 = vpop.xlane.xlu1 %1225 }
 0x1b5   :  { %v2409_v56 = vpop.xlane.xlu0 %1210  ;;  %v1246_v13 = vrot.slane %v2407_v25, 1  ;;  %v1245_v25 = vrot.slane %v2399_v62, 1 }
 0x1b7   :  { %v1265_v39 = vadd.f32 %v1245_v25, %v1177_v44 }
 0x1b8   :  { %v2411_v59 = vpop.xlane.xlu1 %1307 }
 0x1b9   :  { %v1293_v63 = vpop.xlane.xlu0 %1292  ;;  %v1332_v34 = vrot.slane %v2411_v59, 2 }
 0x1ba   :  { %v1327_v49 = vrot.slane %v1293_v63, 2 }
 0x1bb   :  { %v1352_v1 = vadd.f32 %v1332_v34, %v1264_v53 }
 0x1bc   :  { %v2413_v55 = vpop.xlane.xlu1 %1310  ;;  %v1347_v3 = vadd.f32 %v1327_v49, %v1259_v61 }
 0x1bd   :  { %v2415_v37 = vpop.xlane.xlu0 %1295  ;;  %v1333_v47 = vrot.slane %v2413_v55, 2 }
 0x1be   :  { %v1328_v59 = vrot.slane %v2415_v37, 2  ;;  %v1241_v37 = vrot.slane %v2409_v56, 1 }
 0x1bf   :  { %v1353_v18 = vadd.f32 %v1333_v47, %v1265_v39 }
 0x1c0   :  { %v1378_v36 = vpop.xlane.xlu1 %1377 }
 0x1c1   :  { %v1414_v22 = vrot.slane %v1378_v36, 3  ;;  %v1375_v28 = vpop.xlane.xlu0 %1374  ;;  %v1266_v36 = vadd.f32 %v1246_v13, %v1178_v15 }
 0x1c2   :  { %v1413_v60 = vrot.slane %v1375_v28, 3 }
 0x1c3   :  { %v1434_v16 = vadd.f32 %v1414_v22, %v1346_v19  ;;  %v1260_v19 = vadd.f32 %v1240_v41, %v1172_v38 }
 0x1c4   :  { %v1433_v35 = vadd.f32 %v1413_v60, %v1345_v58  ;;  %v1393_v57 = vpop.xlane.xlu1 %1392 }
 0x1c5   :  { %v1390_v33 = vpop.xlane.xlu0 %1389  ;;  %1457 = vperm.xlu1 %1589, %v1434_v16   ;;  %v1419_v46 = vrot.slane %v1393_v57, 3  ;;  %v1348_v7 = vadd.f32 %v1328_v59, %v1260_v19  ;;  %v1261_v57 = vadd.f32 %v1241_v37, %v1173_v14 }
 0x1c6   :  { %v1418_v10 = vrot.slane %v1390_v33, 3  ;;  %1454 = vperm.xlu0 %1588, %v1433_v35  }
 0x1c7   :  { %v1439_v50 = vadd.f32 %v1419_v46, %v1351_v24 }
 0x1c8   :  { %v1438_v20 = vadd.f32 %v1418_v10, %v1350_v17  ;;  %v1314_v45 = vpop.xlane.xlu1 %1313  ;;  %v1484_v10 = vand.u32 127, %v151_v0 }
 0x1c9   :  { %v1299_v29 = vpop.xlane.xlu0 %1298  ;;  %v1334_v31 = vrot.slane %v1314_v45, 2 }
 0x1ca   :  { %1469 = vperm.xlu1 %1589, %v1438_v20   ;;  %v1329_v35 = vrot.slane %v1299_v29, 2  ;;  %v1487_v12 = vsub.s32 %v1484_v10, %v1632_v6 }
 0x1cb   :  { %v1354_v26 = vadd.f32 %v1334_v31, %v1266_v36 }
 0x1cc   :  { %v1396_v2 = vpop.xlane.xlu1 %1395  ;;  %v1349_v55 = vadd.f32 %v1329_v35, %v1261_v57 }
 0x1cd   :  { %v1381_v5 = vpop.xlane.xlu0 %1380  ;;  %v1420_v63 = vrot.slane %v1396_v2, 3 }
 0x1ce   :  { %v1415_v32 = vrot.slane %v1381_v5, 3  ;;  %1472 = vperm.xlu1 %1589, %v1439_v50  }
 0x1cf   :  { %v1440_v51 = vadd.f32 %v1420_v63, %v1352_v1 }
 0x1d0   :  { %v1435_v43 = vadd.f32 %v1415_v32, %v1347_v3  ;;  %v1399_v54 = vpop.xlane.xlu1 %1398 }
 0x1d1   :  { %v1384_v11 = vpop.xlane.xlu0 %1383  ;;  %v1421_v60 = vrot.slane %v1399_v54, 3 }
 0x1d2   :  { %1460 = vperm.xlu1 %1589, %v1435_v43   ;;  %v1416_v22 = vrot.slane %v1384_v11, 3 }
 0x1d3   :  { %v1441_v52 = vadd.f32 %v1421_v60, %v1353_v18 }
 0x1d4   :  { %v1402_v28 = vpop.xlane.xlu1 %1401  ;;  %v1436_v16 = vadd.f32 %v1416_v22, %v1348_v7 }
 0x1d5   :  { %v1422_v58 = vrot.slane %v1402_v28, 3  ;;  %v1387_v62 = vpop.xlane.xlu0 %1386 }
 0x1d6   :  { %1475 = vperm.xlu1 %1589, %v1440_v51   ;;  %v1417_v4 = vrot.slane %v1387_v62, 3 }
 0x1d7   :  { %v1442_v23 = vadd.f32 %v1422_v58, %v1354_v26 }
 0x1d8   :  { %v1437_v33 = vadd.f32 %v1417_v4, %v1349_v55 }
 0x1d9   :  { %1481 = vperm.xlu0 %1588, %v1442_v23  }
 0x1da   :  { %1463 = vperm.xlu1 %1589, %v1436_v16  }
 0x1de   :  { %1478 = vperm.xlu1 %1589, %v1441_v52  }
 0x1e2   :  { %1466 = vperm.xlu1 %1589, %v1437_v33  }
 0x240   :  { %v1458_v48 = vpop.permute.xlu1 %1457 }
 0x241   :  { %v1455_v40 = vpop.permute.xlu0 %1454  ;;  %v1492_v21 = vrot.slane %v1458_v48, %v1487_v12 }
 0x242   :  { %v1488_v24 = vrot.slane %v1455_v40, %v1487_v12 }
 0x244   :  { %v1526_v27 = vsel %vm1525_vm0, %v1492_v21, %v1488_v24 }
 0x245   :  { %v1470_v9 = vpop.permute.xlu1 %1469 }
 0x246   :  { %v1508_v45 = vrot.slane %v1470_v9, %v1487_v12 }
 0x249   :  { %v1473_v56 = vpop.permute.xlu1 %1472 }
 0x24a   :  { %v1512_v46 = vrot.slane %v1473_v56, %v1487_v12 }
 0x24c   :  { %v1533_v8 = vsel %vm1525_vm0, %v1512_v46, %v1508_v45 }
 0x24d   :  { %v1461_v17 = vpop.permute.xlu1 %1460 }
 0x24e   :  { %v1496_v61 = vrot.slane %v1461_v17, %v1487_v12 }
 0x250   :  { %v1528_v32 = vsel %vm1527_vm5, %v1496_v61, %v1526_v27 }
 0x251   :  { %v1476_v30 = vpop.permute.xlu1 %1475 }
 0x252   :  { %v1516_v20 = vrot.slane %v1476_v30, %v1487_v12 }
 0x254   :  { %v1482_v29 = vpop.permute.xlu0 %1481  ;;  %v1534_v50 = vsel %vm1527_vm5, %v1516_v20, %v1533_v8 }
 0x255   :  { %v1464_v42 = vpop.permute.xlu1 %1463  ;;  %v1524_v2 = vrot.slane %v1482_v29, %v1487_v12 }
 0x256   :  { %v1500_v6 = vrot.slane %v1464_v42, %v1487_v12 }
 0x258   :  { %v1530_v53 = vsel %vm1529_vm6, %v1500_v6, %v1528_v32 }
 0x259   :  { %v1479_v49 = vpop.permute.xlu1 %1478 }
 0x25a   :  { %v1520_v0 = vrot.slane %v1479_v49, %v1487_v12 }
 0x25c   :  { %v1535_v5 = vsel %vm1529_vm6, %v1520_v0, %v1534_v50 }
 0x25d   :  { %v1536_v34 = vsel %vm1531_vm7, %v1524_v2, %v1535_v5  ;;  %v1467_v3 = vpop.permute.xlu1 %1466 }
 0x25e   :  { %1541 = vst.msk [vmem:[%s2455_s4 + $0x8] sm:$0x1f] %vm1539_vm8, %v1536_v34  ;;  %v1504_v13 = vrot.slane %v1467_v3, %v1487_v12 }
 0x260   :  { %v1532_v41 = vsel %vm1531_vm7, %v1504_v13, %v1530_v53 }
 0x261   :  { %1540 = vst.msk [vmem:[%s2455_s4] sm:$0x1f] %vm1539_vm8, %v1532_v41 }

</bundles_post_ra>
